<compile_context>
chip_gen: v6e
topology: v6e:2x2x1
jax: 0.10.0
libtpu: 0.0.40
codegen_flags: <defaults>
</compile_context>

<pallas_src>
import functools

import jax
import jax.numpy as jnp
from jax.experimental import pallas as pl
from jax.experimental.pallas import tpu as pltpu

# ---------------- model configuration (consistent with the module) ----------
INPUT_DIM = 16     # input_dim
HIDDEN = 32        # hidden_dim
NUM_LAYERS = 2     # num_layers
OUTPUT_DIM = 4     # output_dim
BATCH = 2
SEQ = 8

BATCH_PAD = 8      # pad batch to a full sublane group
IN_PAD = 128       # pad input features to a full lane group
OUT_PAD = 128      # pad fc output to a full lane group


def lstm_kernel(x_ref, wih0_ref, b0_ref, whh0_ref, wfused_ref, brest_ref,
                fcw_ref, fcb_ref, out_ref, *, num_layers, hidden, seq,
                batch_pad):
    """Entire multi-layer LSTM forward in a single grid-less invocation.

    x_ref     : (S*Bp, IN_PAD) f32  time-major, batch/lane padded input
    wih0_ref  : (IN_PAD, 4H)  f32   layer-0 input weights (sigmoid cols pre-scaled 0.5)
    b0_ref    : (1, 4H)       f32   layer-0 combined bias (pre-scaled)
    whh0_ref  : (4H, 4H)      bf16  layer-0 recurrent weights, rows [H:) zero
    wfused_ref: (L-1, 4H, 4H) bf16  layers>=1: rows [0,H)=W_ih, [H,2H)=W_hh, rest zero
    brest_ref : (max(L-1,1),1,4H) f32  combined biases for layers >= 1 (pre-scaled)
    fcw_ref   : (4H, OUT_PAD) f32   final linear (rows [H:), cols [O:) zero)
    fcb_ref   : (1, OUT_PAD)  f32
    out_ref   : (Bp, OUT_PAD) f32

    h/c are carried as register values 4H lanes wide; h is masked so only
    lanes [0,H) are non-zero, c's junk lanes stay bounded and never reach
    a matmul or the output.
    """
    H = hidden
    G = 4 * H
    Bp = batch_pad
    S = seq
    f32 = jnp.float32
    bf16 = jnp.bfloat16

    # ---- hoisted per-lane constants (computed once, outside the time loop) --
    lane = jax.lax.broadcasted_iota(jnp.int32, (Bp, G), 1)
    is_g = (lane >= 2 * H) & (lane < 3 * H)            # tanh ("g") lane block
    post_mul = jnp.where(is_g, 1.0, 0.5).astype(f32)   # sigmoid(x)=0.5*tanh(x/2)+0.5
    post_add = jnp.where(is_g, 0.0, 0.5).astype(f32)
    h_mask = (lane < H).astype(f32)                    # real h lives in lanes [0,H)

    # ---- layer-0 input projection for the whole sequence: one MXU dot, off
    # the serial recurrence (0.5 sigmoid pre-scale already baked into wih0/b0).
    xproj = jnp.dot(x_ref[...], wih0_ref[...],
                    preferred_element_type=f32) + b0_ref[...]

    # ---- hoisted weight loads and bias broadcasts ---------------------------
    whh0 = whh0_ref[...]
    wfused = [wfused_ref[l - 1] for l in range(1, num_layers)]
    brest = [jnp.broadcast_to(brest_ref[l - 1], (Bp, G))
             for l in range(1, num_layers)]

    def activate(gates):
        # One EUP tanh + one VPU affine covers all four gate blocks.
        return jnp.tanh(gates) * post_mul + post_add

    def combine(act, c_prev):
        # act lane blocks: [ i | f | g | o ]; XLU rolls align f/g/o onto [0,H).
        f_al = pltpu.roll(act, shift=3 * H, axis=1)
        g_al = pltpu.roll(act, shift=2 * H, axis=1)
        o_al = pltpu.roll(act, shift=1 * H, axis=1)
        c_new = f_al * c_prev + act * g_al             # valid in lanes [0,H)
        h_new = o_al * jnp.tanh(c_new) * h_mask        # junk lanes zeroed
        return h_new, c_new

    h = [jnp.zeros((Bp, G), f32) for _ in range(num_layers)]
    c = [jnp.zeros((Bp, G), f32) for _ in range(num_layers)]

    # S is small & static: full unroll.  (Switch to lax.fori_loop if S grows.)
    for t in range(S):
        # Layer 0: only the recurrent bf16 dot sits on the serial critical path.
        gates = xproj[t * Bp:(t + 1) * Bp, :] + jnp.dot(
            h[0].astype(bf16), whh0, preferred_element_type=f32)
        h[0], c[0] = combine(activate(gates), c[0])

        # Layers 1..L-1: h_below in lanes [0,H), h_self rolled to [H,2H),
        # one 128-wide bf16 MXU dot per cell (no concat, K = 4H).
        for l in range(1, num_layers):
            lhs = h[l - 1] + pltpu.roll(h[l], shift=H, axis=1)
            gates = jnp.dot(lhs.astype(bf16), wfused[l - 1],
                            preferred_element_type=f32) + brest[l - 1]
            h[l], c[l] = combine(activate(gates), c[l])

    # Final linear on the last timestep's top-layer hidden state (f32 epilogue).
    out_ref[...] = (jnp.dot(h[num_layers - 1], fcw_ref[...],
                            preferred_element_type=f32)
                    + fcb_ref[...]).astype(out_ref.dtype)


def prepare_params(params):
    """One-time weight prep (pad / fuse / pre-scale / bf16) — NOT in the hot path."""
    H, D, L, O = HIDDEN, INPUT_DIM, NUM_LAYERS, OUTPUT_DIM
    G = 4 * H
    f32 = jnp.float32

    # 0.5 pre-scale on sigmoid (i/f/o) gate columns for the single-tanh trick.
    col = jnp.arange(G)
    pre = jnp.where((col >= 2 * H) & (col < 3 * H), 1.0, 0.5).astype(f32)

    w_ih0 = jnp.zeros((IN_PAD, G), f32).at[:D].set(params["w_ih0"] * pre)
    b0 = params["b"][0] * pre                                       # (1, G)

    w_hh0 = jnp.zeros((G, G), f32).at[:H].set(params["w_hh"][0] * pre)

    n_rest = max(L - 1, 1)
    w_fused = jnp.zeros((n_rest, G, G), f32)
    for l in range(1, L):
        w_fused = w_fused.at[l - 1, :H].set(params["w_ihr"][l - 1] * pre)
        w_fused = w_fused.at[l - 1, H:2 * H].set(params["w_hh"][l] * pre)
    b_rest = (params["b"][1:] * pre if L > 1
              else jnp.zeros((1, 1, G), f32))

    fc_w = jnp.zeros((G, OUT_PAD), f32).at[:H, :O].set(params["fc_w"])
    fc_b = jnp.zeros((1, OUT_PAD), f32).at[:, :O].set(params["fc_b"])

    return {
        "w_ih0": w_ih0,                        # f32: off the serial path
        "b0": b0,
        "w_hh0": w_hh0.astype(jnp.bfloat16),   # bf16 operands for the MXU
        "w_fused": w_fused.astype(jnp.bfloat16),
        "b_rest": b_rest,
        "fc_w": fc_w,                          # f32 epilogue dot
        "fc_b": fc_b,
    }


@jax.jit
def lstm_model_forward(x, prep):
    """x: (B, S, D) float32 -> (B, OUTPUT_DIM) float32."""
    B, S, D = x.shape
    Bp = BATCH_PAD

    # Hot path: pad batch to 8 sublanes + features to 128 lanes, go time-major,
    # flatten to one (S*Bp, 128) slab for the in-kernel projection dot.
    x_pad = jnp.zeros((S, Bp, IN_PAD), jnp.float32).at[:, :B, :D].set(
        jnp.transpose(x, (1, 0, 2)))
    x_flat = x_pad.reshape(S * Bp, IN_PAD)

    vmem = pl.BlockSpec(memory_space=pltpu.MemorySpace.VMEM)
    kernel = functools.partial(lstm_kernel, num_layers=NUM_LAYERS,
                               hidden=HIDDEN, seq=S, batch_pad=Bp)
    out_pad = pl.pallas_call(
        kernel,
        out_shape=jax.ShapeDtypeStruct((Bp, OUT_PAD), jnp.float32),
        in_specs=[vmem] * 8,
        out_specs=vmem,
    )(x_flat, prep["w_ih0"], prep["b0"], prep["w_hh0"], prep["w_fused"],
      prep["b_rest"], prep["fc_w"], prep["fc_b"])

    return out_pad[:B, :OUTPUT_DIM]


def init_params(key):
    """Deterministic init matching PyTorch nn.LSTM / nn.Linear shapes.

    PyTorch stores W_ih (4H, in), W_hh (4H, H); we store the transposes so the
    kernel does row-vector @ matrix on the MXU.  b = b_ih + b_hh (combined).
    h0/c0 are zeroed per forward, matching the module (no cross-call state).
    """
    H, D, L, O = HIDDEN, INPUT_DIM, NUM_LAYERS, OUTPUT_DIM
    k = 1.0 / jnp.sqrt(H)
    keys = jax.random.split(key, 8)
    u = lambda kk, shape: jax.random.uniform(kk, shape, jnp.float32, -k, k)
    return {
        "w_ih0": u(keys[0], (D, 4 * H)),
        "w_ihr": u(keys[1], (max(L - 1, 1), H, 4 * H)),
        "w_hh": u(keys[2], (L, H, 4 * H)),
        "b": u(keys[3], (L, 1, 4 * H)),
        "fc_w": u(keys[4], (H, O)),
        "fc_b": u(keys[5], (1, O)),
    }


def lstm_model_reference(x, params):
    """Pure-JAX f32 reference mirroring torch.nn.LSTM(batch_first=True) + Linear."""
    B, S, D = x.shape
    H, L = HIDDEN, NUM_LAYERS
    h = jnp.zeros((L, B, H), jnp.float32)
    c = jnp.zeros((L, B, H), jnp.float32)
    for t in range(S):
        layer_in = x[:, t, :]
        for l in range(L):
            w_ih = params["w_ih0"] if l == 0 else params["w_ihr"][l - 1]
            gates = layer_in @ w_ih + h[l] @ params["w_hh"][l] + params["b"][l]
            i = jax.nn.sigmoid(gates[:, 0 * H:1 * H])
            f = jax.nn.sigmoid(gates[:, 1 * H:2 * H])
            g = jnp.tanh(gates[:, 2 * H:3 * H])
            o = jax.nn.sigmoid(gates[:, 3 * H:4 * H])
            c_l = f * c[l] + i * g
            h_l = o * jnp.tanh(c_l)
            h = h.at[l].set(h_l)
            c = c.at[l].set(c_l)
            layer_in = h_l
    return layer_in @ params["fc_w"] + params["fc_b"]


if __name__ == "__main__":
    key = jax.random.PRNGKey(0)
    k_param, k_x = jax.random.split(key)
    params = init_params(k_param)
    prep = prepare_params(params)          # one-time weight prep (not per call)
    x = jax.random.normal(k_x, (BATCH, SEQ, INPUT_DIM), jnp.float32)

    out = lstm_model_forward(x, prep)
    out = jax.block_until_ready(out)

    ref = lstm_model_reference(x, params)
    assert out.shape == (BATCH, OUTPUT_DIM)
    # bf16 MXU operands on the recurrent dots -> tolerance loosened vs f32 reference.
    assert jnp.allclose(out, ref, atol=5e-2, rtol=5e-2), (out, ref)
    print("KERNEL_OK")
</pallas_src>

<mosaic_0001>
module attributes {stable_mosaic.version = 11 : i64} {
  func.func @lstm_kernel(%arg0: memref<64x128xf32, #tpu.memory_space<vmem>>, %arg1: memref<128x128xf32, #tpu.memory_space<vmem>>, %arg2: memref<1x128xf32, #tpu.memory_space<vmem>>, %arg3: memref<128x128xbf16, #tpu.memory_space<vmem>>, %arg4: memref<1x128x128xbf16, #tpu.memory_space<vmem>>, %arg5: memref<1x1x128xf32, #tpu.memory_space<vmem>>, %arg6: memref<128x128xf32, #tpu.memory_space<vmem>>, %arg7: memref<1x128xf32, #tpu.memory_space<vmem>>, %arg8: memref<8x128xf32, #tpu.memory_space<vmem>>) attributes {dimension_semantics = [], scalar_prefetch = 0 : i64, scratch_operands = 0 : i64, tpu.core_type = #tpu.core_type<tc>} {
    %0 = tpu.iota {dimensions = array<i32: 1>} : vector<8x128xi32>
    %c64_i32 = arith.constant 64 : i32
    %1 = vector.broadcast %c64_i32 : i32 to vector<8x128xi32>
    %2 = arith.cmpi sge, %0, %1 : vector<8x128xi32>
    %c96_i32 = arith.constant 96 : i32
    %3 = vector.broadcast %c96_i32 : i32 to vector<8x128xi32>
    %4 = arith.cmpi slt, %0, %3 : vector<8x128xi32>
    %5 = arith.andi %2, %4 : vector<8x128xi1>
    %cst = arith.constant 1.000000e+00 : f32
    %cst_0 = arith.constant 5.000000e-01 : f32
    %6 = vector.broadcast %cst : f32 to vector<8x128xf32>
    %7 = vector.broadcast %cst_0 : f32 to vector<8x128xf32>
    %8 = arith.select %5, %6, %7 : vector<8x128xi1>, vector<8x128xf32>
    %cst_1 = arith.constant 0.000000e+00 : f32
    %cst_2 = arith.constant 5.000000e-01 : f32
    %9 = vector.broadcast %cst_1 : f32 to vector<8x128xf32>
    %10 = vector.broadcast %cst_2 : f32 to vector<8x128xf32>
    %11 = arith.select %5, %9, %10 : vector<8x128xi1>, vector<8x128xf32>
    %c32_i32 = arith.constant 32 : i32
    %12 = vector.broadcast %c32_i32 : i32 to vector<8x128xi32>
    %13 = arith.cmpi slt, %0, %12 : vector<8x128xi32>
    %14 = arith.extui %13 : vector<8x128xi1> to vector<8x128xi32>
    %15 = arith.sitofp %14 : vector<8x128xi32> to vector<8x128xf32>
    %c0 = arith.constant 0 : index
    %c0_3 = arith.constant 0 : index
    %16 = vector.load %arg0[%c0, %c0_3] : memref<64x128xf32, #tpu.memory_space<vmem>>, vector<64x128xf32>
    %c0_4 = arith.constant 0 : index
    %c0_5 = arith.constant 0 : index
    %17 = vector.load %arg1[%c0_4, %c0_5] : memref<128x128xf32, #tpu.memory_space<vmem>>, vector<128x128xf32>
    %cst_6 = arith.constant dense<0.000000e+00> : vector<64x128xf32>
    %18 = tpu.matmul %16, %17, %cst_6 {dimension_numbers = #tpu.dot_dimension_numbers<[1], [0], [0], [1], [0, 0, 1, 1], [], []>} : vector<64x128xf32>, vector<128x128xf32>, vector<64x128xf32> -> vector<64x128xf32>
    %c0_7 = arith.constant 0 : index
    %c0_8 = arith.constant 0 : index
    %19 = vector.load %arg2[%c0_7, %c0_8] : memref<1x128xf32, #tpu.memory_space<vmem>>, vector<1x128xf32>
    %20 = vector.broadcast %19 : vector<1x128xf32> to vector<64x128xf32>
    %21 = arith.addf %18, %20 : vector<64x128xf32>
    %c0_9 = arith.constant 0 : index
    %c0_10 = arith.constant 0 : index
    %22 = vector.load %arg3[%c0_9, %c0_10] : memref<128x128xbf16, #tpu.memory_space<vmem>>, vector<128x128xbf16>
    %c0_11 = arith.constant 0 : index
    %c0_12 = arith.constant 0 : index
    %c0_13 = arith.constant 0 : index
    %23 = vector.load %arg4[%c0_11, %c0_12, %c0_13] : memref<1x128x128xbf16, #tpu.memory_space<vmem>>, vector<1x128x128xbf16>
    %24 = vector.shape_cast %23 : vector<1x128x128xbf16> to vector<128x128xbf16>
    %c0_14 = arith.constant 0 : index
    %c0_15 = arith.constant 0 : index
    %c0_16 = arith.constant 0 : index
    %25 = vector.load %arg5[%c0_14, %c0_15, %c0_16] : memref<1x1x128xf32, #tpu.memory_space<vmem>>, vector<1x1x128xf32>
    %26 = vector.shape_cast %25 : vector<1x1x128xf32> to vector<1x128xf32>
    %27 = vector.shape_cast %26 : vector<1x128xf32> to vector<1x128xf32>
    %28 = vector.broadcast %27 : vector<1x128xf32> to vector<8x128xf32>
    %cst_17 = arith.constant 0.000000e+00 : f32
    %29 = vector.broadcast %cst_17 : f32 to vector<8x128xf32>
    %cst_18 = arith.constant 0.000000e+00 : f32
    %30 = vector.broadcast %cst_18 : f32 to vector<8x128xf32>
    %cst_19 = arith.constant 0.000000e+00 : f32
    %31 = vector.broadcast %cst_19 : f32 to vector<8x128xf32>
    %cst_20 = arith.constant 0.000000e+00 : f32
    %32 = vector.broadcast %cst_20 : f32 to vector<8x128xf32>
    %33 = vector.extract_strided_slice %21 {offsets = [0, 0], sizes = [8, 128], strides = [1, 1]} : vector<64x128xf32> to vector<8x128xf32>
    %34 = arith.truncf %29 : vector<8x128xf32> to vector<8x128xbf16>
    %cst_21 = arith.constant dense<0.000000e+00> : vector<8x128xf32>
    %35 = tpu.matmul %34, %22, %cst_21 {dimension_numbers = #tpu.dot_dimension_numbers<[1], [0], [0], [1], [0, 0, 1, 1], [], []>} : vector<8x128xbf16>, vector<128x128xbf16>, vector<8x128xf32> -> vector<8x128xf32>
    %36 = arith.addf %33, %35 : vector<8x128xf32>
    %37 = math.tanh %36 : vector<8x128xf32>
    %38 = arith.mulf %37, %8 : vector<8x128xf32>
    %39 = arith.addf %38, %11 : vector<8x128xf32>
    %c96_i32_22 = arith.constant 96 : i32
    %40 = tpu.dynamic_rotate %39 by %c96_i32_22 dim 1 : vector<8x128xf32>, i32 -> vector<8x128xf32>
    %c64_i32_23 = arith.constant 64 : i32
    %41 = tpu.dynamic_rotate %39 by %c64_i32_23 dim 1 : vector<8x128xf32>, i32 -> vector<8x128xf32>
    %c32_i32_24 = arith.constant 32 : i32
    %42 = tpu.dynamic_rotate %39 by %c32_i32_24 dim 1 : vector<8x128xf32>, i32 -> vector<8x128xf32>
    %43 = arith.mulf %40, %31 : vector<8x128xf32>
    %44 = arith.mulf %39, %41 : vector<8x128xf32>
    %45 = arith.addf %43, %44 : vector<8x128xf32>
    %46 = math.tanh %45 : vector<8x128xf32>
    %47 = arith.mulf %42, %46 : vector<8x128xf32>
    %48 = arith.mulf %47, %15 : vector<8x128xf32>
    %c32_i32_25 = arith.constant 32 : i32
    %49 = tpu.dynamic_rotate %30 by %c32_i32_25 dim 1 : vector<8x128xf32>, i32 -> vector<8x128xf32>
    %50 = arith.addf %48, %49 : vector<8x128xf32>
    %51 = arith.truncf %50 : vector<8x128xf32> to vector<8x128xbf16>
    %cst_26 = arith.constant dense<0.000000e+00> : vector<8x128xf32>
    %52 = tpu.matmul %51, %24, %cst_26 {dimension_numbers = #tpu.dot_dimension_numbers<[1], [0], [0], [1], [0, 0, 1, 1], [], []>} : vector<8x128xbf16>, vector<128x128xbf16>, vector<8x128xf32> -> vector<8x128xf32>
    %53 = arith.addf %52, %28 : vector<8x128xf32>
    %54 = math.tanh %53 : vector<8x128xf32>
    %55 = arith.mulf %54, %8 : vector<8x128xf32>
    %56 = arith.addf %55, %11 : vector<8x128xf32>
    %c96_i32_27 = arith.constant 96 : i32
    %57 = tpu.dynamic_rotate %56 by %c96_i32_27 dim 1 : vector<8x128xf32>, i32 -> vector<8x128xf32>
    %c64_i32_28 = arith.constant 64 : i32
    %58 = tpu.dynamic_rotate %56 by %c64_i32_28 dim 1 : vector<8x128xf32>, i32 -> vector<8x128xf32>
    %c32_i32_29 = arith.constant 32 : i32
    %59 = tpu.dynamic_rotate %56 by %c32_i32_29 dim 1 : vector<8x128xf32>, i32 -> vector<8x128xf32>
    %60 = arith.mulf %57, %32 : vector<8x128xf32>
    %61 = arith.mulf %56, %58 : vector<8x128xf32>
    %62 = arith.addf %60, %61 : vector<8x128xf32>
    %63 = math.tanh %62 : vector<8x128xf32>
    %64 = arith.mulf %59, %63 : vector<8x128xf32>
    %65 = arith.mulf %64, %15 : vector<8x128xf32>
    %66 = vector.extract_strided_slice %21 {offsets = [8, 0], sizes = [8, 128], strides = [1, 1]} : vector<64x128xf32> to vector<8x128xf32>
    %67 = arith.truncf %48 : vector<8x128xf32> to vector<8x128xbf16>
    %cst_30 = arith.constant dense<0.000000e+00> : vector<8x128xf32>
    %68 = tpu.matmul %67, %22, %cst_30 {dimension_numbers = #tpu.dot_dimension_numbers<[1], [0], [0], [1], [0, 0, 1, 1], [], []>} : vector<8x128xbf16>, vector<128x128xbf16>, vector<8x128xf32> -> vector<8x128xf32>
    %69 = arith.addf %66, %68 : vector<8x128xf32>
    %70 = math.tanh %69 : vector<8x128xf32>
    %71 = arith.mulf %70, %8 : vector<8x128xf32>
    %72 = arith.addf %71, %11 : vector<8x128xf32>
    %c96_i32_31 = arith.constant 96 : i32
    %73 = tpu.dynamic_rotate %72 by %c96_i32_31 dim 1 : vector<8x128xf32>, i32 -> vector<8x128xf32>
    %c64_i32_32 = arith.constant 64 : i32
    %74 = tpu.dynamic_rotate %72 by %c64_i32_32 dim 1 : vector<8x128xf32>, i32 -> vector<8x128xf32>
    %c32_i32_33 = arith.constant 32 : i32
    %75 = tpu.dynamic_rotate %72 by %c32_i32_33 dim 1 : vector<8x128xf32>, i32 -> vector<8x128xf32>
    %76 = arith.mulf %73, %45 : vector<8x128xf32>
    %77 = arith.mulf %72, %74 : vector<8x128xf32>
    %78 = arith.addf %76, %77 : vector<8x128xf32>
    %79 = math.tanh %78 : vector<8x128xf32>
    %80 = arith.mulf %75, %79 : vector<8x128xf32>
    %81 = arith.mulf %80, %15 : vector<8x128xf32>
    %c32_i32_34 = arith.constant 32 : i32
    %82 = tpu.dynamic_rotate %65 by %c32_i32_34 dim 1 : vector<8x128xf32>, i32 -> vector<8x128xf32>
    %83 = arith.addf %81, %82 : vector<8x128xf32>
    %84 = arith.truncf %83 : vector<8x128xf32> to vector<8x128xbf16>
    %cst_35 = arith.constant dense<0.000000e+00> : vector<8x128xf32>
    %85 = tpu.matmul %84, %24, %cst_35 {dimension_numbers = #tpu.dot_dimension_numbers<[1], [0], [0], [1], [0, 0, 1, 1], [], []>} : vector<8x128xbf16>, vector<128x128xbf16>, vector<8x128xf32> -> vector<8x128xf32>
    %86 = arith.addf %85, %28 : vector<8x128xf32>
    %87 = math.tanh %86 : vector<8x128xf32>
    %88 = arith.mulf %87, %8 : vector<8x128xf32>
    %89 = arith.addf %88, %11 : vector<8x128xf32>
    %c96_i32_36 = arith.constant 96 : i32
    %90 = tpu.dynamic_rotate %89 by %c96_i32_36 dim 1 : vector<8x128xf32>, i32 -> vector<8x128xf32>
    %c64_i32_37 = arith.constant 64 : i32
    %91 = tpu.dynamic_rotate %89 by %c64_i32_37 dim 1 : vector<8x128xf32>, i32 -> vector<8x128xf32>
    %c32_i32_38 = arith.constant 32 : i32
    %92 = tpu.dynamic_rotate %89 by %c32_i32_38 dim 1 : vector<8x128xf32>, i32 -> vector<8x128xf32>
    %93 = arith.mulf %90, %62 : vector<8x128xf32>
    %94 = arith.mulf %89, %91 : vector<8x128xf32>
    %95 = arith.addf %93, %94 : vector<8x128xf32>
    %96 = math.tanh %95 : vector<8x128xf32>
    %97 = arith.mulf %92, %96 : vector<8x128xf32>
    %98 = arith.mulf %97, %15 : vector<8x128xf32>
    %99 = vector.extract_strided_slice %21 {offsets = [16, 0], sizes = [8, 128], strides = [1, 1]} : vector<64x128xf32> to vector<8x128xf32>
    %100 = arith.truncf %81 : vector<8x128xf32> to vector<8x128xbf16>
    %cst_39 = arith.constant dense<0.000000e+00> : vector<8x128xf32>
    %101 = tpu.matmul %100, %22, %cst_39 {dimension_numbers = #tpu.dot_dimension_numbers<[1], [0], [0], [1], [0, 0, 1, 1], [], []>} : vector<8x128xbf16>, vector<128x128xbf16>, vector<8x128xf32> -> vector<8x128xf32>
    %102 = arith.addf %99, %101 : vector<8x128xf32>
    %103 = math.tanh %102 : vector<8x128xf32>
    %104 = arith.mulf %103, %8 : vector<8x128xf32>
    %105 = arith.addf %104, %11 : vector<8x128xf32>
    %c96_i32_40 = arith.constant 96 : i32
    %106 = tpu.dynamic_rotate %105 by %c96_i32_40 dim 1 : vector<8x128xf32>, i32 -> vector<8x128xf32>
    %c64_i32_41 = arith.constant 64 : i32
    %107 = tpu.dynamic_rotate %105 by %c64_i32_41 dim 1 : vector<8x128xf32>, i32 -> vector<8x128xf32>
    %c32_i32_42 = arith.constant 32 : i32
    %108 = tpu.dynamic_rotate %105 by %c32_i32_42 dim 1 : vector<8x128xf32>, i32 -> vector<8x128xf32>
    %109 = arith.mulf %106, %78 : vector<8x128xf32>
    %110 = arith.mulf %105, %107 : vector<8x128xf32>
    %111 = arith.addf %109, %110 : vector<8x128xf32>
    %112 = math.tanh %111 : vector<8x128xf32>
    %113 = arith.mulf %108, %112 : vector<8x128xf32>
    %114 = arith.mulf %113, %15 : vector<8x128xf32>
    %c32_i32_43 = arith.constant 32 : i32
    %115 = tpu.dynamic_rotate %98 by %c32_i32_43 dim 1 : vector<8x128xf32>, i32 -> vector<8x128xf32>
    %116 = arith.addf %114, %115 : vector<8x128xf32>
    %117 = arith.truncf %116 : vector<8x128xf32> to vector<8x128xbf16>
    %cst_44 = arith.constant dense<0.000000e+00> : vector<8x128xf32>
    %118 = tpu.matmul %117, %24, %cst_44 {dimension_numbers = #tpu.dot_dimension_numbers<[1], [0], [0], [1], [0, 0, 1, 1], [], []>} : vector<8x128xbf16>, vector<128x128xbf16>, vector<8x128xf32> -> vector<8x128xf32>
    %119 = arith.addf %118, %28 : vector<8x128xf32>
    %120 = math.tanh %119 : vector<8x128xf32>
    %121 = arith.mulf %120, %8 : vector<8x128xf32>
    %122 = arith.addf %121, %11 : vector<8x128xf32>
    %c96_i32_45 = arith.constant 96 : i32
    %123 = tpu.dynamic_rotate %122 by %c96_i32_45 dim 1 : vector<8x128xf32>, i32 -> vector<8x128xf32>
    %c64_i32_46 = arith.constant 64 : i32
    %124 = tpu.dynamic_rotate %122 by %c64_i32_46 dim 1 : vector<8x128xf32>, i32 -> vector<8x128xf32>
    %c32_i32_47 = arith.constant 32 : i32
    %125 = tpu.dynamic_rotate %122 by %c32_i32_47 dim 1 : vector<8x128xf32>, i32 -> vector<8x128xf32>
    %126 = arith.mulf %123, %95 : vector<8x128xf32>
    %127 = arith.mulf %122, %124 : vector<8x128xf32>
    %128 = arith.addf %126, %127 : vector<8x128xf32>
    %129 = math.tanh %128 : vector<8x128xf32>
    %130 = arith.mulf %125, %129 : vector<8x128xf32>
    %131 = arith.mulf %130, %15 : vector<8x128xf32>
    %132 = vector.extract_strided_slice %21 {offsets = [24, 0], sizes = [8, 128], strides = [1, 1]} : vector<64x128xf32> to vector<8x128xf32>
    %133 = arith.truncf %114 : vector<8x128xf32> to vector<8x128xbf16>
    %cst_48 = arith.constant dense<0.000000e+00> : vector<8x128xf32>
    %134 = tpu.matmul %133, %22, %cst_48 {dimension_numbers = #tpu.dot_dimension_numbers<[1], [0], [0], [1], [0, 0, 1, 1], [], []>} : vector<8x128xbf16>, vector<128x128xbf16>, vector<8x128xf32> -> vector<8x128xf32>
    %135 = arith.addf %132, %134 : vector<8x128xf32>
    %136 = math.tanh %135 : vector<8x128xf32>
    %137 = arith.mulf %136, %8 : vector<8x128xf32>
    %138 = arith.addf %137, %11 : vector<8x128xf32>
    %c96_i32_49 = arith.constant 96 : i32
    %139 = tpu.dynamic_rotate %138 by %c96_i32_49 dim 1 : vector<8x128xf32>, i32 -> vector<8x128xf32>
    %c64_i32_50 = arith.constant 64 : i32
    %140 = tpu.dynamic_rotate %138 by %c64_i32_50 dim 1 : vector<8x128xf32>, i32 -> vector<8x128xf32>
    %c32_i32_51 = arith.constant 32 : i32
    %141 = tpu.dynamic_rotate %138 by %c32_i32_51 dim 1 : vector<8x128xf32>, i32 -> vector<8x128xf32>
    %142 = arith.mulf %139, %111 : vector<8x128xf32>
    %143 = arith.mulf %138, %140 : vector<8x128xf32>
    %144 = arith.addf %142, %143 : vector<8x128xf32>
    %145 = math.tanh %144 : vector<8x128xf32>
    %146 = arith.mulf %141, %145 : vector<8x128xf32>
    %147 = arith.mulf %146, %15 : vector<8x128xf32>
    %c32_i32_52 = arith.constant 32 : i32
    %148 = tpu.dynamic_rotate %131 by %c32_i32_52 dim 1 : vector<8x128xf32>, i32 -> vector<8x128xf32>
    %149 = arith.addf %147, %148 : vector<8x128xf32>
    %150 = arith.truncf %149 : vector<8x128xf32> to vector<8x128xbf16>
    %cst_53 = arith.constant dense<0.000000e+00> : vector<8x128xf32>
    %151 = tpu.matmul %150, %24, %cst_53 {dimension_numbers = #tpu.dot_dimension_numbers<[1], [0], [0], [1], [0, 0, 1, 1], [], []>} : vector<8x128xbf16>, vector<128x128xbf16>, vector<8x128xf32> -> vector<8x128xf32>
    %152 = arith.addf %151, %28 : vector<8x128xf32>
    %153 = math.tanh %152 : vector<8x128xf32>
    %154 = arith.mulf %153, %8 : vector<8x128xf32>
    %155 = arith.addf %154, %11 : vector<8x128xf32>
    %c96_i32_54 = arith.constant 96 : i32
    %156 = tpu.dynamic_rotate %155 by %c96_i32_54 dim 1 : vector<8x128xf32>, i32 -> vector<8x128xf32>
    %c64_i32_55 = arith.constant 64 : i32
    %157 = tpu.dynamic_rotate %155 by %c64_i32_55 dim 1 : vector<8x128xf32>, i32 -> vector<8x128xf32>
    %c32_i32_56 = arith.constant 32 : i32
    %158 = tpu.dynamic_rotate %155 by %c32_i32_56 dim 1 : vector<8x128xf32>, i32 -> vector<8x128xf32>
    %159 = arith.mulf %156, %128 : vector<8x128xf32>
    %160 = arith.mulf %155, %157 : vector<8x128xf32>
    %161 = arith.addf %159, %160 : vector<8x128xf32>
    %162 = math.tanh %161 : vector<8x128xf32>
    %163 = arith.mulf %158, %162 : vector<8x128xf32>
    %164 = arith.mulf %163, %15 : vector<8x128xf32>
    %165 = vector.extract_strided_slice %21 {offsets = [32, 0], sizes = [8, 128], strides = [1, 1]} : vector<64x128xf32> to vector<8x128xf32>
    %166 = arith.truncf %147 : vector<8x128xf32> to vector<8x128xbf16>
    %cst_57 = arith.constant dense<0.000000e+00> : vector<8x128xf32>
    %167 = tpu.matmul %166, %22, %cst_57 {dimension_numbers = #tpu.dot_dimension_numbers<[1], [0], [0], [1], [0, 0, 1, 1], [], []>} : vector<8x128xbf16>, vector<128x128xbf16>, vector<8x128xf32> -> vector<8x128xf32>
    %168 = arith.addf %165, %167 : vector<8x128xf32>
    %169 = math.tanh %168 : vector<8x128xf32>
    %170 = arith.mulf %169, %8 : vector<8x128xf32>
    %171 = arith.addf %170, %11 : vector<8x128xf32>
    %c96_i32_58 = arith.constant 96 : i32
    %172 = tpu.dynamic_rotate %171 by %c96_i32_58 dim 1 : vector<8x128xf32>, i32 -> vector<8x128xf32>
    %c64_i32_59 = arith.constant 64 : i32
    %173 = tpu.dynamic_rotate %171 by %c64_i32_59 dim 1 : vector<8x128xf32>, i32 -> vector<8x128xf32>
    %c32_i32_60 = arith.constant 32 : i32
    %174 = tpu.dynamic_rotate %171 by %c32_i32_60 dim 1 : vector<8x128xf32>, i32 -> vector<8x128xf32>
    %175 = arith.mulf %172, %144 : vector<8x128xf32>
    %176 = arith.mulf %171, %173 : vector<8x128xf32>
    %177 = arith.addf %175, %176 : vector<8x128xf32>
    %178 = math.tanh %177 : vector<8x128xf32>
    %179 = arith.mulf %174, %178 : vector<8x128xf32>
    %180 = arith.mulf %179, %15 : vector<8x128xf32>
    %c32_i32_61 = arith.constant 32 : i32
    %181 = tpu.dynamic_rotate %164 by %c32_i32_61 dim 1 : vector<8x128xf32>, i32 -> vector<8x128xf32>
    %182 = arith.addf %180, %181 : vector<8x128xf32>
    %183 = arith.truncf %182 : vector<8x128xf32> to vector<8x128xbf16>
    %cst_62 = arith.constant dense<0.000000e+00> : vector<8x128xf32>
    %184 = tpu.matmul %183, %24, %cst_62 {dimension_numbers = #tpu.dot_dimension_numbers<[1], [0], [0], [1], [0, 0, 1, 1], [], []>} : vector<8x128xbf16>, vector<128x128xbf16>, vector<8x128xf32> -> vector<8x128xf32>
    %185 = arith.addf %184, %28 : vector<8x128xf32>
    %186 = math.tanh %185 : vector<8x128xf32>
    %187 = arith.mulf %186, %8 : vector<8x128xf32>
    %188 = arith.addf %187, %11 : vector<8x128xf32>
    %c96_i32_63 = arith.constant 96 : i32
    %189 = tpu.dynamic_rotate %188 by %c96_i32_63 dim 1 : vector<8x128xf32>, i32 -> vector<8x128xf32>
    %c64_i32_64 = arith.constant 64 : i32
    %190 = tpu.dynamic_rotate %188 by %c64_i32_64 dim 1 : vector<8x128xf32>, i32 -> vector<8x128xf32>
    %c32_i32_65 = arith.constant 32 : i32
    %191 = tpu.dynamic_rotate %188 by %c32_i32_65 dim 1 : vector<8x128xf32>, i32 -> vector<8x128xf32>
    %192 = arith.mulf %189, %161 : vector<8x128xf32>
    %193 = arith.mulf %188, %190 : vector<8x128xf32>
    %194 = arith.addf %192, %193 : vector<8x128xf32>
    %195 = math.tanh %194 : vector<8x128xf32>
    %196 = arith.mulf %191, %195 : vector<8x128xf32>
    %197 = arith.mulf %196, %15 : vector<8x128xf32>
    %198 = vector.extract_strided_slice %21 {offsets = [40, 0], sizes = [8, 128], strides = [1, 1]} : vector<64x128xf32> to vector<8x128xf32>
    %199 = arith.truncf %180 : vector<8x128xf32> to vector<8x128xbf16>
    %cst_66 = arith.constant dense<0.000000e+00> : vector<8x128xf32>
    %200 = tpu.matmul %199, %22, %cst_66 {dimension_numbers = #tpu.dot_dimension_numbers<[1], [0], [0], [1], [0, 0, 1, 1], [], []>} : vector<8x128xbf16>, vector<128x128xbf16>, vector<8x128xf32> -> vector<8x128xf32>
    %201 = arith.addf %198, %200 : vector<8x128xf32>
    %202 = math.tanh %201 : vector<8x128xf32>
    %203 = arith.mulf %202, %8 : vector<8x128xf32>
    %204 = arith.addf %203, %11 : vector<8x128xf32>
    %c96_i32_67 = arith.constant 96 : i32
    %205 = tpu.dynamic_rotate %204 by %c96_i32_67 dim 1 : vector<8x128xf32>, i32 -> vector<8x128xf32>
    %c64_i32_68 = arith.constant 64 : i32
    %206 = tpu.dynamic_rotate %204 by %c64_i32_68 dim 1 : vector<8x128xf32>, i32 -> vector<8x128xf32>
    %c32_i32_69 = arith.constant 32 : i32
    %207 = tpu.dynamic_rotate %204 by %c32_i32_69 dim 1 : vector<8x128xf32>, i32 -> vector<8x128xf32>
    %208 = arith.mulf %205, %177 : vector<8x128xf32>
    %209 = arith.mulf %204, %206 : vector<8x128xf32>
    %210 = arith.addf %208, %209 : vector<8x128xf32>
    %211 = math.tanh %210 : vector<8x128xf32>
    %212 = arith.mulf %207, %211 : vector<8x128xf32>
    %213 = arith.mulf %212, %15 : vector<8x128xf32>
    %c32_i32_70 = arith.constant 32 : i32
    %214 = tpu.dynamic_rotate %197 by %c32_i32_70 dim 1 : vector<8x128xf32>, i32 -> vector<8x128xf32>
    %215 = arith.addf %213, %214 : vector<8x128xf32>
    %216 = arith.truncf %215 : vector<8x128xf32> to vector<8x128xbf16>
    %cst_71 = arith.constant dense<0.000000e+00> : vector<8x128xf32>
    %217 = tpu.matmul %216, %24, %cst_71 {dimension_numbers = #tpu.dot_dimension_numbers<[1], [0], [0], [1], [0, 0, 1, 1], [], []>} : vector<8x128xbf16>, vector<128x128xbf16>, vector<8x128xf32> -> vector<8x128xf32>
    %218 = arith.addf %217, %28 : vector<8x128xf32>
    %219 = math.tanh %218 : vector<8x128xf32>
    %220 = arith.mulf %219, %8 : vector<8x128xf32>
    %221 = arith.addf %220, %11 : vector<8x128xf32>
    %c96_i32_72 = arith.constant 96 : i32
    %222 = tpu.dynamic_rotate %221 by %c96_i32_72 dim 1 : vector<8x128xf32>, i32 -> vector<8x128xf32>
    %c64_i32_73 = arith.constant 64 : i32
    %223 = tpu.dynamic_rotate %221 by %c64_i32_73 dim 1 : vector<8x128xf32>, i32 -> vector<8x128xf32>
    %c32_i32_74 = arith.constant 32 : i32
    %224 = tpu.dynamic_rotate %221 by %c32_i32_74 dim 1 : vector<8x128xf32>, i32 -> vector<8x128xf32>
    %225 = arith.mulf %222, %194 : vector<8x128xf32>
    %226 = arith.mulf %221, %223 : vector<8x128xf32>
    %227 = arith.addf %225, %226 : vector<8x128xf32>
    %228 = math.tanh %227 : vector<8x128xf32>
    %229 = arith.mulf %224, %228 : vector<8x128xf32>
    %230 = arith.mulf %229, %15 : vector<8x128xf32>
    %231 = vector.extract_strided_slice %21 {offsets = [48, 0], sizes = [8, 128], strides = [1, 1]} : vector<64x128xf32> to vector<8x128xf32>
    %232 = arith.truncf %213 : vector<8x128xf32> to vector<8x128xbf16>
    %cst_75 = arith.constant dense<0.000000e+00> : vector<8x128xf32>
    %233 = tpu.matmul %232, %22, %cst_75 {dimension_numbers = #tpu.dot_dimension_numbers<[1], [0], [0], [1], [0, 0, 1, 1], [], []>} : vector<8x128xbf16>, vector<128x128xbf16>, vector<8x128xf32> -> vector<8x128xf32>
    %234 = arith.addf %231, %233 : vector<8x128xf32>
    %235 = math.tanh %234 : vector<8x128xf32>
    %236 = arith.mulf %235, %8 : vector<8x128xf32>
    %237 = arith.addf %236, %11 : vector<8x128xf32>
    %c96_i32_76 = arith.constant 96 : i32
    %238 = tpu.dynamic_rotate %237 by %c96_i32_76 dim 1 : vector<8x128xf32>, i32 -> vector<8x128xf32>
    %c64_i32_77 = arith.constant 64 : i32
    %239 = tpu.dynamic_rotate %237 by %c64_i32_77 dim 1 : vector<8x128xf32>, i32 -> vector<8x128xf32>
    %c32_i32_78 = arith.constant 32 : i32
    %240 = tpu.dynamic_rotate %237 by %c32_i32_78 dim 1 : vector<8x128xf32>, i32 -> vector<8x128xf32>
    %241 = arith.mulf %238, %210 : vector<8x128xf32>
    %242 = arith.mulf %237, %239 : vector<8x128xf32>
    %243 = arith.addf %241, %242 : vector<8x128xf32>
    %244 = math.tanh %243 : vector<8x128xf32>
    %245 = arith.mulf %240, %244 : vector<8x128xf32>
    %246 = arith.mulf %245, %15 : vector<8x128xf32>
    %c32_i32_79 = arith.constant 32 : i32
    %247 = tpu.dynamic_rotate %230 by %c32_i32_79 dim 1 : vector<8x128xf32>, i32 -> vector<8x128xf32>
    %248 = arith.addf %246, %247 : vector<8x128xf32>
    %249 = arith.truncf %248 : vector<8x128xf32> to vector<8x128xbf16>
    %cst_80 = arith.constant dense<0.000000e+00> : vector<8x128xf32>
    %250 = tpu.matmul %249, %24, %cst_80 {dimension_numbers = #tpu.dot_dimension_numbers<[1], [0], [0], [1], [0, 0, 1, 1], [], []>} : vector<8x128xbf16>, vector<128x128xbf16>, vector<8x128xf32> -> vector<8x128xf32>
    %251 = arith.addf %250, %28 : vector<8x128xf32>
    %252 = math.tanh %251 : vector<8x128xf32>
    %253 = arith.mulf %252, %8 : vector<8x128xf32>
    %254 = arith.addf %253, %11 : vector<8x128xf32>
    %c96_i32_81 = arith.constant 96 : i32
    %255 = tpu.dynamic_rotate %254 by %c96_i32_81 dim 1 : vector<8x128xf32>, i32 -> vector<8x128xf32>
    %c64_i32_82 = arith.constant 64 : i32
    %256 = tpu.dynamic_rotate %254 by %c64_i32_82 dim 1 : vector<8x128xf32>, i32 -> vector<8x128xf32>
    %c32_i32_83 = arith.constant 32 : i32
    %257 = tpu.dynamic_rotate %254 by %c32_i32_83 dim 1 : vector<8x128xf32>, i32 -> vector<8x128xf32>
    %258 = arith.mulf %255, %227 : vector<8x128xf32>
    %259 = arith.mulf %254, %256 : vector<8x128xf32>
    %260 = arith.addf %258, %259 : vector<8x128xf32>
    %261 = math.tanh %260 : vector<8x128xf32>
    %262 = arith.mulf %257, %261 : vector<8x128xf32>
    %263 = arith.mulf %262, %15 : vector<8x128xf32>
    %264 = vector.extract_strided_slice %21 {offsets = [56, 0], sizes = [8, 128], strides = [1, 1]} : vector<64x128xf32> to vector<8x128xf32>
    %265 = arith.truncf %246 : vector<8x128xf32> to vector<8x128xbf16>
    %cst_84 = arith.constant dense<0.000000e+00> : vector<8x128xf32>
    %266 = tpu.matmul %265, %22, %cst_84 {dimension_numbers = #tpu.dot_dimension_numbers<[1], [0], [0], [1], [0, 0, 1, 1], [], []>} : vector<8x128xbf16>, vector<128x128xbf16>, vector<8x128xf32> -> vector<8x128xf32>
    %267 = arith.addf %264, %266 : vector<8x128xf32>
    %268 = math.tanh %267 : vector<8x128xf32>
    %269 = arith.mulf %268, %8 : vector<8x128xf32>
    %270 = arith.addf %269, %11 : vector<8x128xf32>
    %c96_i32_85 = arith.constant 96 : i32
    %271 = tpu.dynamic_rotate %270 by %c96_i32_85 dim 1 : vector<8x128xf32>, i32 -> vector<8x128xf32>
    %c64_i32_86 = arith.constant 64 : i32
    %272 = tpu.dynamic_rotate %270 by %c64_i32_86 dim 1 : vector<8x128xf32>, i32 -> vector<8x128xf32>
    %c32_i32_87 = arith.constant 32 : i32
    %273 = tpu.dynamic_rotate %270 by %c32_i32_87 dim 1 : vector<8x128xf32>, i32 -> vector<8x128xf32>
    %274 = arith.mulf %271, %243 : vector<8x128xf32>
    %275 = arith.mulf %270, %272 : vector<8x128xf32>
    %276 = arith.addf %274, %275 : vector<8x128xf32>
    %277 = math.tanh %276 : vector<8x128xf32>
    %278 = arith.mulf %273, %277 : vector<8x128xf32>
    %279 = arith.mulf %278, %15 : vector<8x128xf32>
    %c32_i32_88 = arith.constant 32 : i32
    %280 = tpu.dynamic_rotate %263 by %c32_i32_88 dim 1 : vector<8x128xf32>, i32 -> vector<8x128xf32>
    %281 = arith.addf %279, %280 : vector<8x128xf32>
    %282 = arith.truncf %281 : vector<8x128xf32> to vector<8x128xbf16>
    %cst_89 = arith.constant dense<0.000000e+00> : vector<8x128xf32>
    %283 = tpu.matmul %282, %24, %cst_89 {dimension_numbers = #tpu.dot_dimension_numbers<[1], [0], [0], [1], [0, 0, 1, 1], [], []>} : vector<8x128xbf16>, vector<128x128xbf16>, vector<8x128xf32> -> vector<8x128xf32>
    %284 = arith.addf %283, %28 : vector<8x128xf32>
    %285 = math.tanh %284 : vector<8x128xf32>
    %286 = arith.mulf %285, %8 : vector<8x128xf32>
    %287 = arith.addf %286, %11 : vector<8x128xf32>
    %c96_i32_90 = arith.constant 96 : i32
    %288 = tpu.dynamic_rotate %287 by %c96_i32_90 dim 1 : vector<8x128xf32>, i32 -> vector<8x128xf32>
    %c64_i32_91 = arith.constant 64 : i32
    %289 = tpu.dynamic_rotate %287 by %c64_i32_91 dim 1 : vector<8x128xf32>, i32 -> vector<8x128xf32>
    %c32_i32_92 = arith.constant 32 : i32
    %290 = tpu.dynamic_rotate %287 by %c32_i32_92 dim 1 : vector<8x128xf32>, i32 -> vector<8x128xf32>
    %291 = arith.mulf %288, %260 : vector<8x128xf32>
    %292 = arith.mulf %287, %289 : vector<8x128xf32>
    %293 = arith.addf %291, %292 : vector<8x128xf32>
    %294 = math.tanh %293 : vector<8x128xf32>
    %295 = arith.mulf %290, %294 : vector<8x128xf32>
    %296 = arith.mulf %295, %15 : vector<8x128xf32>
    %c0_93 = arith.constant 0 : index
    %c0_94 = arith.constant 0 : index
    %297 = vector.load %arg6[%c0_93, %c0_94] : memref<128x128xf32, #tpu.memory_space<vmem>>, vector<128x128xf32>
    %cst_95 = arith.constant dense<0.000000e+00> : vector<8x128xf32>
    %298 = tpu.matmul %296, %297, %cst_95 {dimension_numbers = #tpu.dot_dimension_numbers<[1], [0], [0], [1], [0, 0, 1, 1], [], []>} : vector<8x128xf32>, vector<128x128xf32>, vector<8x128xf32> -> vector<8x128xf32>
    %c0_96 = arith.constant 0 : index
    %c0_97 = arith.constant 0 : index
    %299 = vector.load %arg7[%c0_96, %c0_97] : memref<1x128xf32, #tpu.memory_space<vmem>>, vector<1x128xf32>
    %300 = vector.broadcast %299 : vector<1x128xf32> to vector<8x128xf32>
    %301 = arith.addf %298, %300 : vector<8x128xf32>
    %c0_98 = arith.constant 0 : index
    %c0_99 = arith.constant 0 : index
    %302 = vector.load %arg8[%c0_98, %c0_99] : memref<8x128xf32, #tpu.memory_space<vmem>>, vector<8x128xf32>
    tpu.vector_store %arg8[%c0_98, %c0_99], %301 {strides = array<i32>} : memref<8x128xf32, #tpu.memory_space<vmem>>, vector<8x128xf32>,
    return
  }
}

</mosaic_0001>

<bundles_post_ra>
// kernel: lstm_model_forward.1
= control target key start
LH: loop header
LB: loop body
LE: loop exit
PB: predicated region body
PF: predicated region fallthrough
CT: control target
= control target key end

     0   :  { %13 = vsyncpa [#allocation3], 0  ;;  %s2876_s0 = inlined_call_operand.vmem [shape: f32[64,128], index: 0, kind: input, shape index: {}]   ;;  %s2877_s1 = inlined_call_operand.hbm [shape: f32[128,128], index: 1, kind: input, shape index: {}]   ;;  %s2878_s2 = inlined_call_operand.vmem [shape: f32[1,128], index: 2, kind: input, shape index: {}]   ;;  %s2879_s3 = inlined_call_operand.vmem [shape: bf16[128,128], index: 3, kind: input, shape index: {}]   ;;  %s2880_s4 = inlined_call_operand.hbm [shape: bf16[1,128,128], index: 4, kind: input, shape index: {}]   ;;  %s2881_s5 = inlined_call_operand.vmem [shape: f32[1,1,128], index: 5, kind: input, shape index: {}]   ;;  %s2882_s6 = inlined_call_operand.hbm [shape: f32[128,128], index: 6, kind: input, shape index: {}]   ;;  %s2883_s7 = inlined_call_operand.vmem [shape: f32[1,128], index: 7, kind: input, shape index: {}]   ;;  %s2884_s8 = inlined_call_operand.vmem [shape: f32[8,128], index: 8, kind: output, shape index: {}]  }
   0x1   :  { %14 = vsyncpa [#allocation5], 0  ;;  %s2158_s27 = smov [#allocation4]  }
   0x2   :  { %s38_s28 = sshll.u32 %s2158_s27, 4  ;;  %s39_s28 = int_to_ptr.vmem [resolvable:$true] %s38_s28 }
   0x3   :  { %s2102_s29 = scalar_lea.vmem %s39_s28, 1024  ;;  %p2107_p1 = scmp.lt.s32.totalorder %s39_s28, %s39_s28 }
   0x4   :  { %p2103_p0 = scmp.ne.s32.totalorder %s39_s28, %s2102_s29  ;;  %p2108_p2 = scmp.lt.s32.totalorder %s2102_s29, %s2102_s29 }
   0x6   :  { %p2109_p3 = por %p2108_p2, %p2107_p1 }
   0x8   :  { %p2110_p4 = pnand %p2109_p3, %p2103_p0 }
   0xa   :  { %2113 = shalt.err (!%p2110_p4)
}
   0xb   :  { %s2159_s30 = smov 64   ;;  %s2160_s9 = smov 4  }
   0xc   :  { %44 = dma.hbm_to_vmem [thread:$0]  %s2880_s4, 1024, %s39_s28, [#allocation5], %s2159_s30, %s2159_s30, %s2160_s9  }
   0xd   :  { %s2161_s12 = smov [#allocation2]  }
   0xe   :  { %s22_s13 = sshll.u32 %s2161_s12, 4  ;;  %s23_s13 = int_to_ptr.vmem [resolvable:$true] %s22_s13 }
   0xf   :  { %s2122_s14 = scalar_lea.vmem %s23_s13, 2048  ;;  %p2127_p6 = scmp.lt.s32.totalorder %s23_s13, %s23_s13 }
  0x10   :  { %p2123_p5 = scmp.ne.s32.totalorder %s23_s13, %s2122_s14  ;;  %p2128_p7 = scmp.lt.s32.totalorder %s2122_s14, %s2122_s14 }
  0x12   :  { %p2129_p8 = por %p2128_p7, %p2127_p6 }
  0x14   :  { %p2130_p9 = pnand %p2129_p8, %p2123_p5 }
  0x16   :  { %2133 = shalt.err (!%p2130_p9)
}
  0x17   :  { %s2162_s15 = smov 128   ;;  %s2163_s16 = smov 8  }
  0x18   :  { %28 = dma.hbm_to_vmem [thread:$0]  %s2877_s1, 2048, %s23_s13, [#allocation3], %s2162_s15, %s2162_s15, %s2163_s16  }
  0x19   :  { %s2164_s19 = smov [#allocation6]  }
  0x1a   :  { %s52_s20 = sshll.u32 %s2164_s19, 4  ;;  %s53_s20 = int_to_ptr.vmem [resolvable:$true] %s52_s20 }
  0x1b   :  { %s2142_s4 = scalar_lea.vmem %s53_s20, 2048  ;;  %p2147_p11 = scmp.lt.s32.totalorder %s53_s20, %s53_s20 }
  0x1c   :  { %p2143_p10 = scmp.ne.s32.totalorder %s53_s20, %s2142_s4  ;;  %p2148_p12 = scmp.lt.s32.totalorder %s2142_s4, %s2142_s4 }
  0x1e   :  { %p2149_p13 = por %p2148_p12, %p2147_p11 }
  0x20   :  { %p2150_p0 = pnand %p2149_p13, %p2143_p10 }
  0x22   :  { %2153 = shalt.err (!%p2150_p0)
}
  0x23   :  { %58 = dma.hbm_to_vmem [thread:$0]  %s2882_s6, 2048, %s53_s20, [#allocation5], %s2162_s15, %s2162_s15, %s2163_s16  }
  0x24   :  { %2154 = dma.done.wait [#allocation3], 2048  }
  0x25   :  { %2155 = vsyncadd [#allocation3], 4294965248 }
  0x26   :  { %2156 = dma.done.wait [#allocation5], 3072  }
  0x27   :  { %2157 = vsyncadd [#allocation5], 4294964224  ;;  %v2165_v0 = vmov 0.0   ;;  %vm2166_vm0 = vmmov 0   ;;  %v104_v1 = vld [vmem:[#allocation2 + $0x78] sm:$0xff]  ;;  %v103_v2 = vld [vmem:[#allocation2 + $0x70] sm:$0xff]  ;;  %v71_v35 = vlaneseq }
  0x28   :  { %1628 = vmatprep.subr.bf16.mxu1 %v2165_v0  ;;  %1644 = vmatprep.mubr.msk.bf16.mxu1 %vm2166_vm0, %v2165_v0  ;;  %v2233_v3 = vld [vmem:[%s2879_s3 + $0x38] sm:$0xff]   ;;  %v102_v4 = vld [vmem:[#allocation2 + $0x68] sm:$0xff]  ;;  %v2239_v5 = vld [vmem:[%s2879_s3 + $0x30] sm:$0xff]   ;;  %v2167_v27 = vmov 0   ;;  %v2168_v41 = vmov 0.5   ;;  %s2169_s29 = smov 32  }
  0x29   :  { %1584 = vmatprep.subr.mxu0 %v104_v1  ;;  %1629 = vmatpush3.bf16.msra.mxu1 %v2233_v3  ;;  %v101_v6 = vld [vmem:[#allocation2 + $0x60] sm:$0xff]  ;;  %v100_v7 = vld [vmem:[#allocation2 + $0x58] sm:$0xff]  ;;  %v2246_v8 = vld [vmem:[%s2879_s3 + $0x28] sm:$0xff]   ;;  %v72_v39 = vand.u32 127, %v71_v35  ;;  %s2170_s9 = smov 96  }
  0x2a   :  { %1585 = vmatpush3.msra.mxu0 %v104_v1  ;;  %1630 = vmatprep.subr.bf16.mxu1 %v2165_v0  ;;  %v99_v9 = vld [vmem:[#allocation2 + $0x50] sm:$0xff]  ;;  %v98_v10 = vld [vmem:[#allocation2 + $0x48] sm:$0xff]  ;;  %v2253_v11 = vld [vmem:[%s2879_s3 + $0x20] sm:$0xff]  }
  0x2b   :  { %1586 = vmatprep.subr.mxu0 %v103_v2  ;;  %v97_v12 = vld [vmem:[#allocation2 + $0x40] sm:$0xff]  ;;  %v96_v13 = vld [vmem:[#allocation2 + $0x38] sm:$0xff]  ;;  %v95_v16 = vld [vmem:[#allocation2 + $0x30] sm:$0xff]  ;;  %vm73_vm1 = vcmp.ge.s32.totalorder %v72_v39, 64  ;;  %vm74_vm2 = vcmp.lt.s32.totalorder %v72_v39, 96  ;;  %vm78_vm4 = vcmp.lt.s32.totalorder %v72_v39, 32 }
  0x2c   :  { %1587 = vmatpush3.msra.mxu0 %v103_v2  ;;  %v2259_v14 = vld [vmem:[%s2879_s3 + $0x18] sm:$0xff]   ;;  %v81_v15 = vld [vmem:[%s2876_s0] sm:$0xff]  ;;  %v94_v17 = vld [vmem:[#allocation2 + $0x28] sm:$0xff] }
  0x2d   :  { %1588 = vmatprep.subr.mxu0 %v102_v4  ;;  %1631 = vmatpush3.bf16.msra.mxu1 %v2239_v5  ;;  %v2270_v18 = vld [vmem:[%s2879_s3 + $0x10] sm:$0xff]   ;;  %v93_v19 = vld [vmem:[#allocation2 + $0x20] sm:$0xff]  ;;  %v92_v20 = vld [vmem:[#allocation2 + $0x18] sm:$0xff] }
  0x2e   :  { %1589 = vmatpush3.msra.mxu0 %v102_v4  ;;  %1632 = vmatprep.subr.bf16.mxu1 %v2165_v0  ;;  %v2277_v21 = vld [vmem:[%s2879_s3 + $0x8] sm:$0xff]   ;;  %v91_v22 = vld [vmem:[#allocation2 + $0x10] sm:$0xff]  ;;  %v2284_v24 = vld [vmem:[%s2879_s3] sm:$0xff]   ;;  %v2386_v4 = vsel %vm78_vm4, 1.0, %v2165_v0 }
  0x2f   :  { %1590 = vmatprep.subr.mxu0 %v101_v6  ;;  %1616 = vmatprep.mubr.f32.mxu0 %v81_v15  ;;  %v90_v23 = vld [vmem:[#allocation2 + $0x8] sm:$0xff]  ;;  %v89_v25 = vld [vmem:[#allocation2] sm:$0xff]  ;;  %v2311_v28 = vld [vmem:[#allocation4 + $0x38] sm:$0xff]  }
  0x30   :  { %1591 = vmatpush3.msra.mxu0 %v101_v6  ;;  %v82_v26 = vld [vmem:[%s2876_s0 + $0x8] sm:$0xff]  ;;  %v2320_v31 = vld [vmem:[%s2878_s2] ss:$0 sm:$0xff]  ;;  %v2323_v40 = vld [vmem:[#allocation4 + $0x30] sm:$0xff]  }
  0x31   :  { %1592 = vmatprep.subr.mxu0 %v100_v7  ;;  %1633 = vmatpush3.bf16.msra.mxu1 %v2246_v8  ;;  %vm75_vm3 = vmand %vm73_vm1, %vm74_vm2  ;;  %v2329_v43 = vld [vmem:[#allocation4 + $0x28] sm:$0xff]   ;;  %v2334_v46 = vld [vmem:[#allocation4 + $0x20] sm:$0xff]  }
  0x32   :  { %1593 = vmatpush3.msra.mxu0 %v100_v7  ;;  %1634 = vmatprep.subr.bf16.mxu1 %v2165_v0  ;;  %v2327_v42 = vsel %vm75_vm3, 1.0, %v2168_v41  ;;  %v2331_v45 = vsel %vm75_vm3, 0.0, %v2168_v41  ;;  %v83_v47 = vld [vmem:[%s2876_s0 + $0x10] sm:$0xff]  ;;  %v84_v49 = vld [vmem:[%s2876_s0 + $0x18] sm:$0xff]  ;;  %v85_v50 = vld [vmem:[%s2876_s0 + $0x20] sm:$0xff] }
  0x33   :  { %1594 = vmatprep.subr.mxu0 %v99_v9  ;;  %v86_v52 = vld [vmem:[%s2876_s0 + $0x28] sm:$0xff]  ;;  %v2352_v53 = vld [vmem:[#allocation4 + $0x18] sm:$0xff]   ;;  %v87_v54 = vld [vmem:[%s2876_s0 + $0x30] sm:$0xff] }
  0x34   :  { %1595 = vmatpush3.msra.mxu0 %v99_v9  ;;  %v88_v55 = vld [vmem:[%s2876_s0 + $0x38] sm:$0xff]  ;;  %v2364_v56 = vld [vmem:[#allocation4 + $0x10] sm:$0xff]   ;;  %v2373_v57 = vld [vmem:[#allocation4 + $0x8] sm:$0xff]  }
  0x35   :  { %1596 = vmatprep.subr.mxu0 %v98_v10  ;;  %1635 = vmatpush3.bf16.msra.mxu1 %v2253_v11  ;;  %v2378_v58 = vld [vmem:[#allocation4] sm:$0xff]  }
  0x36   :  { %1597 = vmatpush3.msra.mxu0 %v98_v10  ;;  %1636 = vmatprep.subr.bf16.mxu1 %v2165_v0 }
  0x37   :  { %1598 = vmatprep.subr.mxu0 %v97_v12 }
  0x38   :  { %1599 = vmatpush3.msra.mxu0 %v97_v12 }
  0x39   :  { %1600 = vmatprep.subr.mxu0 %v96_v13  ;;  %1637 = vmatpush3.bf16.msra.mxu1 %v2259_v14 }
  0x3a   :  { %1601 = vmatpush3.msra.mxu0 %v96_v13  ;;  %1638 = vmatprep.subr.bf16.mxu1 %v2165_v0 }
  0x3b   :  { %1602 = vmatprep.subr.mxu0 %v95_v16 }
  0x3c   :  { %1603 = vmatpush3.msra.mxu0 %v95_v16 }
  0x3d   :  { %1604 = vmatprep.subr.mxu0 %v94_v17  ;;  %1639 = vmatpush3.bf16.msra.mxu1 %v2270_v18 }
  0x3e   :  { %1605 = vmatpush3.msra.mxu0 %v94_v17  ;;  %1640 = vmatprep.subr.bf16.mxu1 %v2165_v0 }
  0x3f   :  { %1606 = vmatprep.subr.mxu0 %v93_v19 }
  0x40   :  { %1607 = vmatpush3.msra.mxu0 %v93_v19 }
  0x41   :  { %1608 = vmatprep.subr.mxu0 %v92_v20  ;;  %1641 = vmatpush3.bf16.msra.mxu1 %v2277_v21 }
  0x42   :  { %1609 = vmatpush3.msra.mxu0 %v92_v20  ;;  %1642 = vmatprep.subr.bf16.mxu1 %v2165_v0 }
  0x43   :  { %1610 = vmatprep.subr.mxu0 %v91_v22 }
  0x44   :  { %1611 = vmatpush3.msra.mxu0 %v91_v22 }
  0x45   :  { %1612 = vmatprep.subr.mxu0 %v90_v23  ;;  %1643 = vmatpush3.bf16.msra.mxu1 %v2284_v24 }
  0x46   :  { %1613 = vmatpush3.msra.mxu0 %v90_v23  ;;  %1668 = vmatprep.subr.bf16.mxu1 %v2165_v0 }
  0x47   :  { %1614 = vmatprep.subr.mxu0 %v89_v25 }
  0x48   :  { %1615 = vmatpush3.msra.mxu0 %v89_v25  ;;  %1645 = vmatmul.mubr.bf16.vlgmr.msra.gmra.mxu1 %v2167_v27 }
  0x49   :  { %1617 = vmatmul.mubr.f32.vlgmr.msra.gmra.mxu0 %v82_v26  ;;  %1648 = vmatprep.subr.bf16.mxu0 %v2165_v0  ;;  %v2442_v26 = vld [vmem:[%s2881_s5] ss:$0 sm:$0xff] }
  0x4a   :  { %1669 = vmatpush3.bf16.msra.mxu1 %v2233_v3  ;;  %1684 = vmatprep.mubr.msk.bf16.mxu1 %vm2166_vm0, %v2165_v0 }
  0x4b   :  { %1670 = vmatprep.subr.bf16.mxu1 %v2165_v0  ;;  %1649 = vmatpush3.bf16.msra.mxu0 %v2311_v28 }
  0x4c   :  { %1650 = vmatprep.subr.bf16.mxu0 %v2165_v0  ;;  %1619 = vmatprep.mubr.f32.mxu0 %v83_v47 }
  0x4d   :  { %1620 = vmatmul.mubr.f32.gmra.mxu0 %v84_v49 }
  0x4e   :  { %1671 = vmatpush3.bf16.msra.mxu1 %v2239_v5  ;;  %1622 = vmatprep.mubr.f32.mxu0 %v85_v50 }
  0x4f   :  { %1672 = vmatprep.subr.bf16.mxu1 %v2165_v0  ;;  %1651 = vmatpush3.bf16.msra.mxu0 %v2323_v40 }
  0x50   :  { %1652 = vmatprep.subr.bf16.mxu0 %v2165_v0 }
  0x51   :  { %1623 = vmatmul.mubr.f32.gmra.mxu0 %v86_v52 }
  0x52   :  { %1673 = vmatpush3.bf16.msra.mxu1 %v2246_v8  ;;  %1625 = vmatprep.mubr.f32.mxu0 %v87_v54 }
  0x53   :  { %1674 = vmatprep.subr.bf16.mxu1 %v2165_v0  ;;  %1653 = vmatpush3.bf16.msra.mxu0 %v2329_v43 }
  0x54   :  { %1654 = vmatprep.subr.bf16.mxu0 %v2165_v0 }
  0x55   :  { %1626 = vmatmul.mubr.f32.gmra.mxu0 %v88_v55 }
  0x56   :  { %1675 = vmatpush3.bf16.msra.mxu1 %v2253_v11  ;;  %1664 = vmatprep.mubr.msk.bf16.mxu0 %vm2166_vm0, %v2165_v0 }
  0x57   :  { %1676 = vmatprep.subr.bf16.mxu1 %v2165_v0  ;;  %1655 = vmatpush3.bf16.msra.mxu0 %v2334_v46 }
  0x58   :  { %1656 = vmatprep.subr.bf16.mxu0 %v2165_v0 }
  0x5a   :  { %1677 = vmatpush3.bf16.msra.mxu1 %v2259_v14 }
  0x5b   :  { %1678 = vmatprep.subr.bf16.mxu1 %v2165_v0  ;;  %1657 = vmatpush3.bf16.msra.mxu0 %v2352_v53 }
  0x5c   :  { %1658 = vmatprep.subr.bf16.mxu0 %v2165_v0 }
  0x5e   :  { %1679 = vmatpush3.bf16.msra.mxu1 %v2270_v18 }
  0x5f   :  { %1680 = vmatprep.subr.bf16.mxu1 %v2165_v0  ;;  %1659 = vmatpush3.bf16.msra.mxu0 %v2364_v56 }
  0x60   :  { %1660 = vmatprep.subr.bf16.mxu0 %v2165_v0 }
  0x62   :  { %1681 = vmatpush3.bf16.msra.mxu1 %v2277_v21 }
  0x63   :  { %1682 = vmatprep.subr.bf16.mxu1 %v2165_v0  ;;  %1661 = vmatpush3.bf16.msra.mxu0 %v2373_v57 }
  0x64   :  { %1662 = vmatprep.subr.bf16.mxu0 %v2165_v0 }
  0x66   :  { %1683 = vmatpush3.bf16.msra.mxu1 %v2284_v24 }
  0x67   :  { %1708 = vmatprep.subr.bf16.mxu1 %v2165_v0  ;;  %1663 = vmatpush3.bf16.msra.mxu0 %v2378_v58 }
  0x68   :  { %1688 = vmatprep.subr.bf16.mxu0 %v2165_v0 }
 0x108   :  { %v338_v30 = vpop.f32.mrf.mxu1 }
 0x109   :  { %v2315_v29 = vpop.f32.mrf.mxu0 }
 0x10a   :  { %v1646_v34 = vpop.f32.mrf.mxu1  ;;  %v184_v22 = vadd.f32 %v2315_v29, %v2320_v31 }
 0x10b   :  { %v178_v32 = vpop.f32.mrf.mxu0 }
 0x10c   :  { %v179_v33 = vadd.f32 %v2320_v31, %v178_v32  ;;  %v341_v37 = vpop.f32.mrf.mxu1 }
 0x10d   :  { %v2425_v15 = vpop.f32.mrf.mxu0 }
 0x10e   :  { %v344_v36 = vadd.f32 %v338_v30, %v179_v33  ;;  %v1647_v38 = vpop.f32.mrf.mxu1 }
 0x10f   :  { %v2427_v16 = vpop.f32.mrf.mxu0 }
 0x110   :  { %2012 = vtanh.f32 %v344_v36 }
 0x111   :  { %v2429_v17 = vpop.f32.mrf.mxu0 }
 0x113   :  { %v2431_v19 = vpop.f32.mrf.mxu0 }
 0x115   :  { %v2433_v20 = vpop.f32.mrf.mxu0 }
 0x117   :  { %v2437_v23 = vpop.f32.mrf.mxu0 }
 0x11d   :  { %v2013_v44 = vpop.eup %2012 }
 0x11e   :  { %v346_v48 = vmul.f32 %v2013_v44, %v2327_v42 }
 0x120   :  { %v347_v51 = vadd.f32 %v346_v48, %v2331_v45 }
 0x122   :  { %352 = vrot.lane.b32.xlu1 %v347_v51, %s2169_s29  ;;  %348 = vrot.lane.b32.xlu0 %v347_v51, %s2170_s9 }
 0x126   :  { %350 = vrot.lane.b32.xlu0 %v347_v51, %s2159_s30  ;;  %360 = vrot.lane.b32.xlu1 %v2165_v0, %s2169_s29 }
 0x194   :  { %v349_v59 = vpop.permute.xlu0 %348  ;;  %v353_v1 = vpop.permute.xlu1 %352 }
 0x195   :  { %v354_v61 = vmul.f32 0.0, %v349_v59 }
 0x198   :  { %v351_v60 = vpop.permute.xlu0 %350  ;;  %v361_v7 = vpop.permute.xlu1 %360 }
 0x199   :  { %v355_v62 = vmul.f32 %v351_v60, %v347_v51 }
 0x19b   :  { %v2382_v63 = vadd.f32 %v355_v62, %v354_v61 }
 0x19d   :  { %2014 = vtanh.f32 %v2382_v63 }
 0x1aa   :  { %v2015_v2 = vpop.eup %2014 }
 0x1ab   :  { %v358_v6 = vmul.f32 %v2015_v2, %v353_v1 }
 0x1ad   :  { %v359_v9 = vmul.f32 %v2386_v4, %v358_v6 }
 0x1af   :  { %v362_v10 = vadd.f32 %v361_v7, %v359_v9  ;;  %v467_v12 = vpack.c.bf16 %v359_v9, %v359_v9 }
 0x1b1   :  { %v363_v13 = vpack.c.bf16 %v362_v10, %v362_v10  ;;  %1685 = vmatmul.mubr.bf16.vlgmr.msra.gmra.mxu1 %v467_v12 }
 0x1b2   :  { %1709 = vmatpush3.bf16.msra.mxu1 %v2233_v3  ;;  %1724 = vmatprep.mubr.msk.bf16.mxu1 %vm2166_vm0, %v2165_v0 }
 0x1b3   :  { %1665 = vmatmul.mubr.bf16.vlgmr.msra.gmra.mxu0 %v363_v13  ;;  %1710 = vmatprep.subr.bf16.mxu1 %v2165_v0 }
 0x1b4   :  { %1689 = vmatpush3.bf16.msra.mxu0 %v2311_v28  ;;  %1704 = vmatprep.mubr.msk.bf16.mxu0 %vm2166_vm0, %v2165_v0 }
 0x1b5   :  { %1690 = vmatprep.subr.bf16.mxu0 %v2165_v0 }
 0x1b6   :  { %1711 = vmatpush3.bf16.msra.mxu1 %v2239_v5 }
 0x1b7   :  { %1712 = vmatprep.subr.bf16.mxu1 %v2165_v0 }
 0x1b8   :  { %1691 = vmatpush3.bf16.msra.mxu0 %v2323_v40 }
 0x1b9   :  { %1692 = vmatprep.subr.bf16.mxu0 %v2165_v0 }
 0x1ba   :  { %1713 = vmatpush3.bf16.msra.mxu1 %v2246_v8 }
 0x1bb   :  { %1714 = vmatprep.subr.bf16.mxu1 %v2165_v0 }
 0x1bc   :  { %1693 = vmatpush3.bf16.msra.mxu0 %v2329_v43 }
 0x1bd   :  { %1694 = vmatprep.subr.bf16.mxu0 %v2165_v0 }
 0x1be   :  { %1715 = vmatpush3.bf16.msra.mxu1 %v2253_v11 }
 0x1bf   :  { %1716 = vmatprep.subr.bf16.mxu1 %v2165_v0 }
 0x1c0   :  { %1695 = vmatpush3.bf16.msra.mxu0 %v2334_v46 }
 0x1c1   :  { %1696 = vmatprep.subr.bf16.mxu0 %v2165_v0 }
 0x1c2   :  { %1717 = vmatpush3.bf16.msra.mxu1 %v2259_v14 }
 0x1c3   :  { %1718 = vmatprep.subr.bf16.mxu1 %v2165_v0 }
 0x1c4   :  { %1697 = vmatpush3.bf16.msra.mxu0 %v2352_v53 }
 0x1c5   :  { %1698 = vmatprep.subr.bf16.mxu0 %v2165_v0 }
 0x1c6   :  { %1719 = vmatpush3.bf16.msra.mxu1 %v2270_v18 }
 0x1c7   :  { %1720 = vmatprep.subr.bf16.mxu1 %v2165_v0 }
 0x1c8   :  { %1699 = vmatpush3.bf16.msra.mxu0 %v2364_v56 }
 0x1c9   :  { %1700 = vmatprep.subr.bf16.mxu0 %v2165_v0 }
 0x1ca   :  { %1721 = vmatpush3.bf16.msra.mxu1 %v2277_v21 }
 0x1cb   :  { %1722 = vmatprep.subr.bf16.mxu1 %v2165_v0 }
 0x1cc   :  { %1701 = vmatpush3.bf16.msra.mxu0 %v2373_v57 }
 0x1cd   :  { %1702 = vmatprep.subr.bf16.mxu0 %v2165_v0 }
 0x1ce   :  { %1723 = vmatpush3.bf16.msra.mxu1 %v2284_v24 }
 0x1cf   :  { %1748 = vmatprep.subr.bf16.mxu1 %v2165_v0 }
 0x1d0   :  { %1703 = vmatpush3.bf16.msra.mxu0 %v2378_v58 }
 0x1d1   :  { %1728 = vmatprep.subr.bf16.mxu0 %v2165_v0 }
 0x271   :  { %v502_v25 = vpop.f32.mrf.mxu1 }
 0x272   :  { %v508_v27 = vadd.f32 %v502_v25, %v184_v22 }
 0x273   :  { %v446_v30 = vpop.f32.mrf.mxu0  ;;  %v1686_v32 = vpop.f32.mrf.mxu1 }
 0x274   :  { %v447_v33 = vadd.f32 %v2442_v26, %v446_v30  ;;  %2016 = vtanh.f32 %v508_v27  ;;  %v189_v30 = vadd.f32 %v2320_v31, %v2427_v16 }
 0x275   :  { %v1666_v34 = vpop.f32.mrf.mxu0  ;;  %v505_v35 = vpop.f32.mrf.mxu1 }
 0x276   :  { %2018 = vtanh.f32 %v447_v33 }
 0x277   :  { %v449_v36 = vpop.f32.mrf.mxu0  ;;  %v1687_v37 = vpop.f32.mrf.mxu1 }
 0x279   :  { %v1667_v29 = vpop.f32.mrf.mxu0 }
 0x281   :  { %v2017_v38 = vpop.eup %2016 }
 0x282   :  { %v510_v47 = vmul.f32 %v2017_v38, %v2327_v42 }
 0x283   :  { %v2019_v39 = vpop.eup %2018 }
 0x284   :  { %v453_v41 = vmul.f32 %v2019_v39, %v2327_v42  ;;  %v511_v48 = vadd.f32 %v510_v47, %v2331_v45 }
 0x286   :  { %v454_v44 = vadd.f32 %v453_v41, %v2331_v45 }
 0x288   :  { %457 = vrot.lane.b32.xlu1 %v454_v44, %s2159_s30  ;;  %455 = vrot.lane.b32.xlu0 %v454_v44, %s2170_s9 }
 0x28c   :  { %512 = vrot.lane.b32.xlu1 %v511_v48, %s2170_s9  ;;  %459 = vrot.lane.b32.xlu0 %v454_v44, %s2169_s29 }
 0x290   :  { %516 = vrot.lane.b32.xlu1 %v511_v48, %s2169_s29  ;;  %514 = vrot.lane.b32.xlu0 %v511_v48, %s2159_s30 }
 0x2fa   :  { %v458_v49 = vpop.permute.xlu1 %457  ;;  %v456_v50 = vpop.permute.xlu0 %455 }
 0x2fb   :  { %v462_v51 = vmul.f32 %v458_v49, %v454_v44  ;;  %v461_v52 = vmul.f32 0.0, %v456_v50 }
 0x2fd   :  { %v2455_v54 = vadd.f32 %v462_v51, %v461_v52 }
 0x2fe   :  { %v460_v55 = vpop.permute.xlu0 %459  ;;  %v513_v59 = vpop.permute.xlu1 %512 }
 0x2ff   :  { %2020 = vtanh.f32 %v2455_v54  ;;  %v518_v61 = vmul.f32 %v513_v59, %v2382_v63 }
 0x302   :  { %v515_v60 = vpop.permute.xlu0 %514  ;;  %v517_v10 = vpop.permute.xlu1 %516 }
 0x303   :  { %v519_v62 = vmul.f32 %v515_v60, %v511_v48 }
 0x305   :  { %v2459_v1 = vadd.f32 %v519_v62, %v518_v61 }
 0x307   :  { %2022 = vtanh.f32 %v2459_v1 }
 0x30c   :  { %v2021_v2 = vpop.eup %2020 }
 0x30d   :  { %v465_v6 = vmul.f32 %v2021_v2, %v460_v55 }
 0x30f   :  { %v466_v7 = vmul.f32 %v2386_v4, %v465_v6 }
 0x311   :  { %524 = vrot.lane.b32.xlu0 %v466_v7, %s2169_s29 }
 0x314   :  { %v2023_v9 = vpop.eup %2022 }
 0x315   :  { %v522_v12 = vmul.f32 %v2023_v9, %v517_v10 }
 0x317   :  { %v523_v13 = vmul.f32 %v2386_v4, %v522_v12 }
 0x319   :  { %v583_v22 = vpack.c.bf16 %v523_v13, %v523_v13 }
 0x31b   :  { %1725 = vmatmul.mubr.bf16.vlgmr.msra.gmra.mxu1 %v583_v22 }
 0x31c   :  { %1749 = vmatpush3.bf16.msra.mxu1 %v2233_v3  ;;  %1764 = vmatprep.mubr.msk.bf16.mxu1 %vm2166_vm0, %v2165_v0 }
 0x31d   :  { %1750 = vmatprep.subr.bf16.mxu1 %v2165_v0 }
 0x320   :  { %1751 = vmatpush3.bf16.msra.mxu1 %v2239_v5 }
 0x321   :  { %1752 = vmatprep.subr.bf16.mxu1 %v2165_v0 }
 0x324   :  { %1753 = vmatpush3.bf16.msra.mxu1 %v2246_v8 }
 0x325   :  { %1754 = vmatprep.subr.bf16.mxu1 %v2165_v0 }
 0x328   :  { %1755 = vmatpush3.bf16.msra.mxu1 %v2253_v11 }
 0x329   :  { %1756 = vmatprep.subr.bf16.mxu1 %v2165_v0 }
 0x32c   :  { %1757 = vmatpush3.bf16.msra.mxu1 %v2259_v14 }
 0x32d   :  { %1758 = vmatprep.subr.bf16.mxu1 %v2165_v0 }
 0x330   :  { %1759 = vmatpush3.bf16.msra.mxu1 %v2270_v18 }
 0x331   :  { %1760 = vmatprep.subr.bf16.mxu1 %v2165_v0 }
 0x334   :  { %1761 = vmatpush3.bf16.msra.mxu1 %v2277_v21 }
 0x335   :  { %1762 = vmatprep.subr.bf16.mxu1 %v2165_v0 }
 0x338   :  { %1763 = vmatpush3.bf16.msra.mxu1 %v2284_v24 }
 0x339   :  { %1788 = vmatprep.subr.bf16.mxu1 %v2165_v0 }
 0x383   :  { %v525_v63 = vpop.permute.xlu0 %524 }
 0x384   :  { %v526_v25 = vadd.f32 %v525_v63, %v523_v13 }
 0x386   :  { %v527_v27 = vpack.c.bf16 %v526_v25, %v526_v25 }
 0x388   :  { %1705 = vmatmul.mubr.bf16.vlgmr.msra.gmra.mxu0 %v527_v27 }
 0x389   :  { %1729 = vmatpush3.bf16.msra.mxu0 %v2311_v28  ;;  %1744 = vmatprep.mubr.msk.bf16.mxu0 %vm2166_vm0, %v2165_v0 }
 0x38a   :  { %1730 = vmatprep.subr.bf16.mxu0 %v2165_v0 }
 0x38d   :  { %1731 = vmatpush3.bf16.msra.mxu0 %v2323_v40 }
 0x38e   :  { %1732 = vmatprep.subr.bf16.mxu0 %v2165_v0 }
 0x391   :  { %1733 = vmatpush3.bf16.msra.mxu0 %v2329_v43 }
 0x392   :  { %1734 = vmatprep.subr.bf16.mxu0 %v2165_v0 }
 0x395   :  { %1735 = vmatpush3.bf16.msra.mxu0 %v2334_v46 }
 0x396   :  { %1736 = vmatprep.subr.bf16.mxu0 %v2165_v0 }
 0x399   :  { %1737 = vmatpush3.bf16.msra.mxu0 %v2352_v53 }
 0x39a   :  { %1738 = vmatprep.subr.bf16.mxu0 %v2165_v0 }
 0x39d   :  { %1739 = vmatpush3.bf16.msra.mxu0 %v2364_v56 }
 0x39e   :  { %1740 = vmatprep.subr.bf16.mxu0 %v2165_v0 }
 0x3a1   :  { %1741 = vmatpush3.bf16.msra.mxu0 %v2373_v57 }
 0x3a2   :  { %1742 = vmatprep.subr.bf16.mxu0 %v2165_v0 }
 0x3a5   :  { %1743 = vmatpush3.bf16.msra.mxu0 %v2378_v58 }
 0x3a6   :  { %1768 = vmatprep.subr.bf16.mxu0 %v2165_v0 }
 0x3db   :  { %v618_v32 = vpop.f32.mrf.mxu1 }
 0x3dc   :  { %v624_v33 = vadd.f32 %v618_v32, %v189_v30 }
 0x3dd   :  { %v1726_v34 = vpop.f32.mrf.mxu1 }
 0x3de   :  { %2024 = vtanh.f32 %v624_v33  ;;  %v194_v33 = vadd.f32 %v2425_v15, %v2320_v31 }
 0x3df   :  { %v621_v35 = vpop.f32.mrf.mxu1 }
 0x3e1   :  { %v1727_v36 = vpop.f32.mrf.mxu1 }
 0x3eb   :  { %v2025_v44 = vpop.eup %2024 }
 0x3ec   :  { %v626_v16 = vmul.f32 %v2025_v44, %v2327_v42 }
 0x3ee   :  { %v627_v50 = vadd.f32 %v626_v16, %v2331_v45 }
 0x448   :  { %v562_v37 = vpop.f32.mrf.mxu0 }
 0x449   :  { %v563_v29 = vadd.f32 %v2442_v26, %v562_v37 }
 0x44a   :  { %v1706_v38 = vpop.f32.mrf.mxu0 }
 0x44b   :  { %2026 = vtanh.f32 %v563_v29 }
 0x44c   :  { %v565_v39 = vpop.f32.mrf.mxu0 }
 0x44e   :  { %v1707_v41 = vpop.f32.mrf.mxu0 }
 0x458   :  { %v2027_v47 = vpop.eup %2026 }
 0x459   :  { %v569_v48 = vmul.f32 %v2027_v47, %v2327_v42 }
 0x45b   :  { %v570_v49 = vadd.f32 %v569_v48, %v2331_v45 }
 0x45d   :  { %573 = vrot.lane.b32.xlu0 %v570_v49, %s2159_s30  ;;  %571 = vrot.lane.b32.xlu1 %v570_v49, %s2170_s9 }
 0x461   :  { %628 = vrot.lane.b32.xlu0 %v627_v50, %s2170_s9  ;;  %575 = vrot.lane.b32.xlu1 %v570_v49, %s2169_s29 }
 0x465   :  { %632 = vrot.lane.b32.xlu0 %v627_v50, %s2169_s29  ;;  %630 = vrot.lane.b32.xlu1 %v627_v50, %s2159_s30 }
 0x4cf   :  { %v574_v51 = vpop.permute.xlu0 %573  ;;  %v572_v52 = vpop.permute.xlu1 %571 }
 0x4d0   :  { %v578_v55 = vmul.f32 %v574_v51, %v570_v49  ;;  %v577_v59 = vmul.f32 %v572_v52, %v2455_v54 }
 0x4d2   :  { %v2515_v60 = vadd.f32 %v578_v55, %v577_v59 }
 0x4d3   :  { %v576_v61 = vpop.permute.xlu1 %575  ;;  %v629_v62 = vpop.permute.xlu0 %628 }
 0x4d4   :  { %2028 = vtanh.f32 %v2515_v60  ;;  %v634_v6 = vmul.f32 %v629_v62, %v2459_v1 }
 0x4d7   :  { %v631_v2 = vpop.permute.xlu1 %630  ;;  %v633_v22 = vpop.permute.xlu0 %632 }
 0x4d8   :  { %v635_v7 = vmul.f32 %v631_v2, %v627_v50 }
 0x4da   :  { %v2519_v9 = vadd.f32 %v635_v7, %v634_v6 }
 0x4dc   :  { %2030 = vtanh.f32 %v2519_v9 }
 0x4e1   :  { %v2029_v10 = vpop.eup %2028 }
 0x4e2   :  { %v581_v12 = vmul.f32 %v2029_v10, %v576_v61 }
 0x4e4   :  { %v582_v13 = vmul.f32 %v2386_v4, %v581_v12 }
 0x4e6   :  { %640 = vrot.lane.b32.xlu1 %v582_v13, %s2169_s29 }
 0x4e9   :  { %v2031_v54 = vpop.eup %2030 }
 0x4ea   :  { %v638_v63 = vmul.f32 %v2031_v54, %v633_v22 }
 0x4ec   :  { %v639_v25 = vmul.f32 %v2386_v4, %v638_v63 }
 0x4ee   :  { %v699_v27 = vpack.c.bf16 %v639_v25, %v639_v25 }
 0x4f0   :  { %1765 = vmatmul.mubr.bf16.vlgmr.msra.gmra.mxu1 %v699_v27 }
 0x4f1   :  { %1789 = vmatpush3.bf16.msra.mxu1 %v2233_v3  ;;  %1804 = vmatprep.mubr.msk.bf16.mxu1 %vm2166_vm0, %v2165_v0 }
 0x4f2   :  { %1790 = vmatprep.subr.bf16.mxu1 %v2165_v0 }
 0x4f5   :  { %1791 = vmatpush3.bf16.msra.mxu1 %v2239_v5 }
 0x4f6   :  { %1792 = vmatprep.subr.bf16.mxu1 %v2165_v0 }
 0x4f9   :  { %1793 = vmatpush3.bf16.msra.mxu1 %v2246_v8 }
 0x4fa   :  { %1794 = vmatprep.subr.bf16.mxu1 %v2165_v0 }
 0x4fd   :  { %1795 = vmatpush3.bf16.msra.mxu1 %v2253_v11 }
 0x4fe   :  { %1796 = vmatprep.subr.bf16.mxu1 %v2165_v0 }
 0x501   :  { %1797 = vmatpush3.bf16.msra.mxu1 %v2259_v14 }
 0x502   :  { %1798 = vmatprep.subr.bf16.mxu1 %v2165_v0 }
 0x505   :  { %1799 = vmatpush3.bf16.msra.mxu1 %v2270_v18 }
 0x506   :  { %1800 = vmatprep.subr.bf16.mxu1 %v2165_v0 }
 0x509   :  { %1801 = vmatpush3.bf16.msra.mxu1 %v2277_v21 }
 0x50a   :  { %1802 = vmatprep.subr.bf16.mxu1 %v2165_v0 }
 0x50d   :  { %1803 = vmatpush3.bf16.msra.mxu1 %v2284_v24 }
 0x50e   :  { %1828 = vmatprep.subr.bf16.mxu1 %v2165_v0 }
 0x558   :  { %v641_v1 = vpop.permute.xlu1 %640 }
 0x559   :  { %v642_v30 = vadd.f32 %v641_v1, %v639_v25 }
 0x55b   :  { %v643_v32 = vpack.c.bf16 %v642_v30, %v642_v30 }
 0x55d   :  { %1745 = vmatmul.mubr.bf16.vlgmr.msra.gmra.mxu0 %v643_v32 }
 0x55e   :  { %1769 = vmatpush3.bf16.msra.mxu0 %v2311_v28  ;;  %1784 = vmatprep.mubr.msk.bf16.mxu0 %vm2166_vm0, %v2165_v0 }
 0x55f   :  { %1770 = vmatprep.subr.bf16.mxu0 %v2165_v0 }
 0x562   :  { %1771 = vmatpush3.bf16.msra.mxu0 %v2323_v40 }
 0x563   :  { %1772 = vmatprep.subr.bf16.mxu0 %v2165_v0 }
 0x566   :  { %1773 = vmatpush3.bf16.msra.mxu0 %v2329_v43 }
 0x567   :  { %1774 = vmatprep.subr.bf16.mxu0 %v2165_v0 }
 0x56a   :  { %1775 = vmatpush3.bf16.msra.mxu0 %v2334_v46 }
 0x56b   :  { %1776 = vmatprep.subr.bf16.mxu0 %v2165_v0 }
 0x56e   :  { %1777 = vmatpush3.bf16.msra.mxu0 %v2352_v53 }
 0x56f   :  { %1778 = vmatprep.subr.bf16.mxu0 %v2165_v0 }
 0x572   :  { %1779 = vmatpush3.bf16.msra.mxu0 %v2364_v56 }
 0x573   :  { %1780 = vmatprep.subr.bf16.mxu0 %v2165_v0 }
 0x576   :  { %1781 = vmatpush3.bf16.msra.mxu0 %v2373_v57 }
 0x577   :  { %1782 = vmatprep.subr.bf16.mxu0 %v2165_v0 }
 0x57a   :  { %1783 = vmatpush3.bf16.msra.mxu0 %v2378_v58 }
 0x57b   :  { %1808 = vmatprep.subr.bf16.mxu0 %v2165_v0 }
 0x5b0   :  { %v734_v34 = vpop.f32.mrf.mxu1 }
 0x5b1   :  { %v740_v35 = vadd.f32 %v734_v34, %v194_v33 }
 0x5b2   :  { %v1766_v36 = vpop.f32.mrf.mxu1 }
 0x5b3   :  { %2032 = vtanh.f32 %v740_v35 }
 0x5b4   :  { %v737_v37 = vpop.f32.mrf.mxu1 }
 0x5b6   :  { %v1767_v29 = vpop.f32.mrf.mxu1 }
 0x5c0   :  { %v2033_v48 = vpop.eup %2032 }
 0x5c1   :  { %v742_v15 = vmul.f32 %v2033_v48, %v2327_v42 }
 0x5c3   :  { %v743_v51 = vadd.f32 %v742_v15, %v2331_v45 }
 0x61d   :  { %v678_v38 = vpop.f32.mrf.mxu0 }
 0x61e   :  { %v679_v39 = vadd.f32 %v2442_v26, %v678_v38 }
 0x61f   :  { %v1746_v41 = vpop.f32.mrf.mxu0 }
 0x620   :  { %2034 = vtanh.f32 %v679_v39 }
 0x621   :  { %v681_v44 = vpop.f32.mrf.mxu0 }
 0x623   :  { %v1747_v47 = vpop.f32.mrf.mxu0 }
 0x62d   :  { %v2035_v49 = vpop.eup %2034 }
 0x62e   :  { %v685_v16 = vmul.f32 %v2035_v49, %v2327_v42 }
 0x630   :  { %v686_v50 = vadd.f32 %v685_v16, %v2331_v45 }
 0x632   :  { %689 = vrot.lane.b32.xlu1 %v686_v50, %s2159_s30  ;;  %687 = vrot.lane.b32.xlu0 %v686_v50, %s2170_s9 }
 0x636   :  { %744 = vrot.lane.b32.xlu1 %v743_v51, %s2170_s9  ;;  %691 = vrot.lane.b32.xlu0 %v686_v50, %s2169_s29 }
 0x63a   :  { %748 = vrot.lane.b32.xlu1 %v743_v51, %s2169_s29  ;;  %746 = vrot.lane.b32.xlu0 %v743_v51, %s2159_s30 }
 0x6a4   :  { %v690_v52 = vpop.permute.xlu1 %689  ;;  %v688_v55 = vpop.permute.xlu0 %687 }
 0x6a5   :  { %v694_v59 = vmul.f32 %v690_v52, %v686_v50  ;;  %v693_v61 = vmul.f32 %v688_v55, %v2515_v60 }
 0x6a7   :  { %v2575_v62 = vadd.f32 %v694_v59, %v693_v61 }
 0x6a8   :  { %v692_v2 = vpop.permute.xlu0 %691  ;;  %v745_v6 = vpop.permute.xlu1 %744 }
 0x6a9   :  { %2036 = vtanh.f32 %v2575_v62  ;;  %v750_v10 = vmul.f32 %v745_v6, %v2519_v9 }
 0x6ac   :  { %v747_v7 = vpop.permute.xlu0 %746  ;;  %v749_v25 = vpop.permute.xlu1 %748 }
 0x6ad   :  { %v751_v12 = vmul.f32 %v747_v7, %v743_v51 }
 0x6af   :  { %v2579_v13 = vadd.f32 %v751_v12, %v750_v10 }
 0x6b1   :  { %2038 = vtanh.f32 %v2579_v13 }
 0x6b6   :  { %v2037_v54 = vpop.eup %2036 }
 0x6b7   :  { %v697_v22 = vmul.f32 %v2037_v54, %v692_v2 }
 0x6b9   :  { %v698_v63 = vmul.f32 %v2386_v4, %v697_v22 }
 0x6bb   :  { %756 = vrot.lane.b32.xlu0 %v698_v63, %s2169_s29 }
 0x6be   :  { %v2039_v60 = vpop.eup %2038 }
 0x6bf   :  { %v754_v27 = vmul.f32 %v2039_v60, %v749_v25  ;;  %v2657_v25 = vld [vmem:[%s2879_s3 + $0x30] sm:$0xff]  }
 0x6c1   :  { %v755_v1 = vmul.f32 %v2386_v4, %v754_v27  ;;  %v2664_v27 = vld [vmem:[%s2879_s3 + $0x28] sm:$0xff]  }
 0x6c3   :  { %v815_v30 = vpack.c.bf16 %v755_v1, %v755_v1 }
 0x6c5   :  { %1805 = vmatmul.mubr.bf16.vlgmr.msra.gmra.mxu1 %v815_v30  ;;  %v2678_v30 = vld [vmem:[%s2879_s3 + $0x18] sm:$0xff]  }
 0x6c6   :  { %1829 = vmatpush3.bf16.msra.mxu1 %v2233_v3  ;;  %1844 = vmatprep.mubr.msk.bf16.mxu1 %vm2166_vm0, %v2165_v0 }
 0x6c7   :  { %1830 = vmatprep.subr.bf16.mxu1 %v2165_v0 }
 0x6ca   :  { %1831 = vmatpush3.bf16.msra.mxu1 %v2239_v5 }
 0x6cb   :  { %1832 = vmatprep.subr.bf16.mxu1 %v2165_v0 }
 0x6ce   :  { %1833 = vmatpush3.bf16.msra.mxu1 %v2246_v8 }
 0x6cf   :  { %1834 = vmatprep.subr.bf16.mxu1 %v2165_v0 }
 0x6d2   :  { %1835 = vmatpush3.bf16.msra.mxu1 %v2253_v11  ;;  %v199_v11 = vadd.f32 %v2320_v31, %v2431_v19 }
 0x6d3   :  { %1836 = vmatprep.subr.bf16.mxu1 %v2165_v0 }
 0x6d6   :  { %1837 = vmatpush3.bf16.msra.mxu1 %v2259_v14 }
 0x6d7   :  { %1838 = vmatprep.subr.bf16.mxu1 %v2165_v0 }
 0x6da   :  { %1839 = vmatpush3.bf16.msra.mxu1 %v2270_v18 }
 0x6db   :  { %1840 = vmatprep.subr.bf16.mxu1 %v2165_v0 }
 0x6de   :  { %1841 = vmatpush3.bf16.msra.mxu1 %v2277_v21 }
 0x6df   :  { %1842 = vmatprep.subr.bf16.mxu1 %v2165_v0 }
 0x6e2   :  { %1843 = vmatpush3.bf16.msra.mxu1 %v2284_v24 }
 0x6e3   :  { %1868 = vmatprep.subr.bf16.mxu1 %v2165_v0 }
 0x72d   :  { %v757_v3 = vpop.permute.xlu0 %756 }
 0x72e   :  { %v758_v5 = vadd.f32 %v757_v3, %v755_v1  ;;  %v2671_v1 = vld [vmem:[%s2879_s3 + $0x20] sm:$0xff]  }
 0x730   :  { %v759_v8 = vpack.c.bf16 %v758_v5, %v758_v5 }
 0x732   :  { %1785 = vmatmul.mubr.bf16.vlgmr.msra.gmra.mxu0 %v759_v8 }
 0x733   :  { %1809 = vmatpush3.bf16.msra.mxu0 %v2311_v28  ;;  %1824 = vmatprep.mubr.msk.bf16.mxu0 %vm2166_vm0, %v2165_v0 }
 0x734   :  { %1810 = vmatprep.subr.bf16.mxu0 %v2165_v0 }
 0x737   :  { %1811 = vmatpush3.bf16.msra.mxu0 %v2323_v40 }
 0x738   :  { %1812 = vmatprep.subr.bf16.mxu0 %v2165_v0 }
 0x73b   :  { %1813 = vmatpush3.bf16.msra.mxu0 %v2329_v43 }
 0x73c   :  { %1814 = vmatprep.subr.bf16.mxu0 %v2165_v0 }
 0x73f   :  { %1815 = vmatpush3.bf16.msra.mxu0 %v2334_v46 }
 0x740   :  { %1816 = vmatprep.subr.bf16.mxu0 %v2165_v0 }
 0x743   :  { %1817 = vmatpush3.bf16.msra.mxu0 %v2352_v53 }
 0x744   :  { %1818 = vmatprep.subr.bf16.mxu0 %v2165_v0 }
 0x747   :  { %1819 = vmatpush3.bf16.msra.mxu0 %v2364_v56 }
 0x748   :  { %1820 = vmatprep.subr.bf16.mxu0 %v2165_v0 }
 0x74b   :  { %1821 = vmatpush3.bf16.msra.mxu0 %v2373_v57 }
 0x74c   :  { %1822 = vmatprep.subr.bf16.mxu0 %v2165_v0 }
 0x74f   :  { %1823 = vmatpush3.bf16.msra.mxu0 %v2378_v58 }
 0x750   :  { %1848 = vmatprep.subr.bf16.mxu0 %v2165_v0 }
 0x785   :  { %v850_v14 = vpop.f32.mrf.mxu1 }
 0x786   :  { %v856_v9 = vadd.f32 %v850_v14, %v199_v11 }
 0x787   :  { %v1806_v32 = vpop.f32.mrf.mxu1 }
 0x788   :  { %2040 = vtanh.f32 %v856_v9 }
 0x789   :  { %v853_v33 = vpop.f32.mrf.mxu1 }
 0x78b   :  { %v1807_v34 = vpop.f32.mrf.mxu1 }
 0x795   :  { %v2041_v39 = vpop.eup %2040 }
 0x796   :  { %v858_v19 = vmul.f32 %v2041_v39, %v2327_v42 }
 0x798   :  { %v859_v48 = vadd.f32 %v858_v19, %v2331_v45 }
 0x7f2   :  { %v794_v35 = vpop.f32.mrf.mxu0 }
 0x7f3   :  { %v795_v36 = vadd.f32 %v2442_v26, %v794_v35 }
 0x7f4   :  { %v1786_v37 = vpop.f32.mrf.mxu0 }
 0x7f5   :  { %2042 = vtanh.f32 %v795_v36 }
 0x7f6   :  { %v797_v29 = vpop.f32.mrf.mxu0 }
 0x7f8   :  { %v1787_v38 = vpop.f32.mrf.mxu0 }
 0x802   :  { %v2043_v41 = vpop.eup %2042 }
 0x803   :  { %v801_v44 = vmul.f32 %v2043_v41, %v2327_v42 }
 0x805   :  { %v802_v47 = vadd.f32 %v801_v44, %v2331_v45 }
 0x807   :  { %805 = vrot.lane.b32.xlu0 %v802_v47, %s2159_s30  ;;  %803 = vrot.lane.b32.xlu1 %v802_v47, %s2170_s9 }
 0x80b   :  { %860 = vrot.lane.b32.xlu0 %v859_v48, %s2170_s9  ;;  %807 = vrot.lane.b32.xlu1 %v802_v47, %s2169_s29 }
 0x80f   :  { %864 = vrot.lane.b32.xlu0 %v859_v48, %s2169_s29  ;;  %862 = vrot.lane.b32.xlu1 %v859_v48, %s2159_s30 }
 0x879   :  { %v806_v49 = vpop.permute.xlu0 %805  ;;  %v804_v16 = vpop.permute.xlu1 %803 }
 0x87a   :  { %v810_v50 = vmul.f32 %v806_v49, %v802_v47  ;;  %v809_v15 = vmul.f32 %v804_v16, %v2575_v62 }
 0x87c   :  { %v2635_v51 = vadd.f32 %v810_v50, %v809_v15 }
 0x87d   :  { %v808_v52 = vpop.permute.xlu1 %807  ;;  %v861_v55 = vpop.permute.xlu0 %860 }
 0x87e   :  { %2044 = vtanh.f32 %v2635_v51  ;;  %v866_v61 = vmul.f32 %v861_v55, %v2579_v13  ;;  %v2648_v13 = vld [vmem:[%s2879_s3 + $0x38] sm:$0xff]  }
 0x881   :  { %v863_v59 = vpop.permute.xlu1 %862  ;;  %v865_v54 = vpop.permute.xlu0 %864 }
 0x882   :  { %v867_v2 = vmul.f32 %v863_v59, %v859_v48 }
 0x884   :  { %v2639_v6 = vadd.f32 %v867_v2, %v866_v61 }
 0x886   :  { %2046 = vtanh.f32 %v2639_v6 }
 0x88b   :  { %v2045_v7 = vpop.eup %2044 }
 0x88c   :  { %v813_v10 = vmul.f32 %v2045_v7, %v808_v52  ;;  %v2082_v7 = vld [vmem:[%s2879_s3 + $0x8] sm:$0xff]  }
 0x88e   :  { %v814_v12 = vmul.f32 %v2386_v4, %v813_v10  ;;  %v2083_v10 = vld [vmem:[%s2879_s3] sm:$0xff]  }
 0x890   :  { %872 = vrot.lane.b32.xlu1 %v814_v12, %s2169_s29 }
 0x893   :  { %v2047_v62 = vpop.eup %2046 }
 0x894   :  { %v870_v22 = vmul.f32 %v2047_v62, %v865_v54 }
 0x896   :  { %v871_v63 = vmul.f32 %v2386_v4, %v870_v22  ;;  %v2754_v22 = vld [vmem:[#allocation4 + $0x38] sm:$0xff]  }
 0x898   :  { %v931_v60 = vpack.c.bf16 %v871_v63, %v871_v63 }
 0x89a   :  { %1845 = vmatmul.mubr.bf16.vlgmr.msra.gmra.mxu1 %v931_v60  ;;  %v2764_v60 = vld [vmem:[#allocation4 + $0x28] sm:$0xff]  }
 0x89b   :  { %1869 = vmatpush3.bf16.msra.mxu1 %v2648_v13  ;;  %1884 = vmatprep.mubr.msk.bf16.mxu1 %vm2166_vm0, %v2165_v0 }
 0x89c   :  { %1870 = vmatprep.subr.bf16.mxu1 %v2165_v0 }
 0x89f   :  { %1871 = vmatpush3.bf16.msra.mxu1 %v2657_v25 }
 0x8a0   :  { %1872 = vmatprep.subr.bf16.mxu1 %v2165_v0 }
 0x8a3   :  { %1873 = vmatpush3.bf16.msra.mxu1 %v2664_v27 }
 0x8a4   :  { %1874 = vmatprep.subr.bf16.mxu1 %v2165_v0 }
 0x8a7   :  { %1875 = vmatpush3.bf16.msra.mxu1 %v2671_v1 }
 0x8a8   :  { %1876 = vmatprep.subr.bf16.mxu1 %v2165_v0 }
 0x8ab   :  { %1877 = vmatpush3.bf16.msra.mxu1 %v2678_v30 }
 0x8ac   :  { %1878 = vmatprep.subr.bf16.mxu1 %v2165_v0 }
 0x8af   :  { %1879 = vmatpush3.bf16.msra.mxu1 %v2270_v18  ;;  %v204_v18 = vadd.f32 %v2429_v17, %v2320_v31 }
 0x8b0   :  { %1880 = vmatprep.subr.bf16.mxu1 %v2165_v0 }
 0x8b3   :  { %1881 = vmatpush3.bf16.msra.mxu1 %v2277_v21 }
 0x8b4   :  { %1882 = vmatprep.subr.bf16.mxu1 %v2165_v0 }
 0x8b7   :  { %1883 = vmatpush3.bf16.msra.mxu1 %v2284_v24 }
 0x8b8   :  { %1908 = vmatprep.subr.bf16.mxu1 %v2165_v0 }
 0x902   :  { %v873_v3 = vpop.permute.xlu1 %872 }
 0x903   :  { %v874_v5 = vadd.f32 %v873_v3, %v871_v63  ;;  %v2760_v63 = vld [vmem:[#allocation4 + $0x30] sm:$0xff]  }
 0x905   :  { %v875_v8 = vpack.c.bf16 %v874_v5, %v874_v5 }
 0x907   :  { %1825 = vmatmul.mubr.bf16.vlgmr.msra.gmra.mxu0 %v875_v8 }
 0x908   :  { %1849 = vmatpush3.bf16.msra.mxu0 %v2311_v28  ;;  %1864 = vmatprep.mubr.msk.bf16.mxu0 %vm2166_vm0, %v2165_v0 }
 0x909   :  { %1850 = vmatprep.subr.bf16.mxu0 %v2165_v0 }
 0x90c   :  { %1851 = vmatpush3.bf16.msra.mxu0 %v2323_v40 }
 0x90d   :  { %1852 = vmatprep.subr.bf16.mxu0 %v2165_v0 }
 0x910   :  { %1853 = vmatpush3.bf16.msra.mxu0 %v2329_v43 }
 0x911   :  { %1854 = vmatprep.subr.bf16.mxu0 %v2165_v0 }
 0x914   :  { %1855 = vmatpush3.bf16.msra.mxu0 %v2334_v46 }
 0x915   :  { %1856 = vmatprep.subr.bf16.mxu0 %v2165_v0 }
 0x918   :  { %1857 = vmatpush3.bf16.msra.mxu0 %v2352_v53 }
 0x919   :  { %1858 = vmatprep.subr.bf16.mxu0 %v2165_v0 }
 0x91c   :  { %1859 = vmatpush3.bf16.msra.mxu0 %v2364_v56 }
 0x91d   :  { %1860 = vmatprep.subr.bf16.mxu0 %v2165_v0 }
 0x920   :  { %1861 = vmatpush3.bf16.msra.mxu0 %v2373_v57 }
 0x921   :  { %1862 = vmatprep.subr.bf16.mxu0 %v2165_v0 }
 0x924   :  { %1863 = vmatpush3.bf16.msra.mxu0 %v2378_v58 }
 0x925   :  { %1888 = vmatprep.subr.bf16.mxu0 %v2165_v0 }
 0x95a   :  { %v966_v21 = vpop.f32.mrf.mxu1 }
 0x95b   :  { %v972_v24 = vadd.f32 %v966_v21, %v204_v18 }
 0x95c   :  { %v1846_v28 = vpop.f32.mrf.mxu1 }
 0x95d   :  { %2048 = vtanh.f32 %v972_v24 }
 0x95e   :  { %v969_v40 = vpop.f32.mrf.mxu1 }
 0x960   :  { %v1847_v43 = vpop.f32.mrf.mxu1 }
 0x96a   :  { %v2049_v33 = vpop.eup %2048 }
 0x96b   :  { %v974_v31 = vmul.f32 %v2049_v33, %v2327_v42 }
 0x96d   :  { %v975_v17 = vadd.f32 %v974_v31, %v2331_v45 }
 0x9c7   :  { %v910_v46 = vpop.f32.mrf.mxu0 }
 0x9c8   :  { %v911_v11 = vadd.f32 %v2442_v26, %v910_v46 }
 0x9c9   :  { %v1826_v14 = vpop.f32.mrf.mxu0 }
 0x9ca   :  { %2050 = vtanh.f32 %v911_v11 }
 0x9cb   :  { %v913_v9 = vpop.f32.mrf.mxu0 }
 0x9cd   :  { %v1827_v32 = vpop.f32.mrf.mxu0 }
 0x9d7   :  { %v2051_v34 = vpop.eup %2050 }
 0x9d8   :  { %v917_v35 = vmul.f32 %v2051_v34, %v2327_v42 }
 0x9da   :  { %v918_v36 = vadd.f32 %v917_v35, %v2331_v45 }
 0x9dc   :  { %921 = vrot.lane.b32.xlu1 %v918_v36, %s2159_s30  ;;  %919 = vrot.lane.b32.xlu0 %v918_v36, %s2170_s9 }
 0x9e0   :  { %976 = vrot.lane.b32.xlu1 %v975_v17, %s2170_s9  ;;  %923 = vrot.lane.b32.xlu0 %v918_v36, %s2169_s29 }
 0x9e4   :  { %980 = vrot.lane.b32.xlu1 %v975_v17, %s2169_s29  ;;  %978 = vrot.lane.b32.xlu0 %v975_v17, %s2159_s30 }
 0xa4e   :  { %v922_v37 = vpop.permute.xlu1 %921  ;;  %v920_v29 = vpop.permute.xlu0 %919 }
 0xa4f   :  { %v926_v38 = vmul.f32 %v922_v37, %v918_v36  ;;  %v925_v39 = vmul.f32 %v920_v29, %v2635_v51 }
 0xa51   :  { %v2720_v41 = vadd.f32 %v926_v38, %v925_v39 }
 0xa52   :  { %v924_v44 = vpop.permute.xlu0 %923  ;;  %v977_v47 = vpop.permute.xlu1 %976 }
 0xa53   :  { %2052 = vtanh.f32 %v2720_v41  ;;  %v982_v48 = vmul.f32 %v977_v47, %v2639_v6  ;;  %v2081_v6 = vld [vmem:[%s2879_s3 + $0x10] sm:$0xff]  }
 0xa56   :  { %v979_v19 = vpop.permute.xlu0 %978  ;;  %v981_v55 = vpop.permute.xlu1 %980 }
 0xa57   :  { %v983_v49 = vmul.f32 %v979_v19, %v975_v17 }
 0xa59   :  { %v2724_v16 = vadd.f32 %v983_v49, %v982_v48 }
 0xa5b   :  { %2054 = vtanh.f32 %v2724_v16 }
 0xa60   :  { %v2053_v50 = vpop.eup %2052 }
 0xa61   :  { %v929_v15 = vmul.f32 %v2053_v50, %v924_v44  ;;  %v2089_v50 = vld [vmem:[#allocation4 + $0x18] sm:$0xff]  }
 0xa63   :  { %v930_v52 = vmul.f32 %v2386_v4, %v929_v15  ;;  %v2090_v15 = vld [vmem:[#allocation4 + $0x10] sm:$0xff]  }
 0xa65   :  { %988 = vrot.lane.b32.xlu0 %v930_v52, %s2169_s29  ;;  %v2091_v52 = vld [vmem:[#allocation4 + $0x8] sm:$0xff]  }
 0xa68   :  { %v2055_v51 = vpop.eup %2054 }
 0xa69   :  { %v986_v59 = vmul.f32 %v2055_v51, %v981_v55  ;;  %v2092_v51 = vld [vmem:[#allocation4] sm:$0xff]  }
 0xa6b   :  { %v987_v61 = vmul.f32 %v2386_v4, %v986_v59 }
 0xa6d   :  { %v1047_v2 = vpack.c.bf16 %v987_v61, %v987_v61 }
 0xa6f   :  { %1885 = vmatmul.mubr.bf16.vlgmr.msra.gmra.mxu1 %v1047_v2 }
 0xa70   :  { %1909 = vmatpush3.bf16.msra.mxu1 %v2648_v13  ;;  %1924 = vmatprep.mubr.msk.bf16.mxu1 %vm2166_vm0, %v2165_v0  ;;  %v2768_v13 = vld [vmem:[#allocation4 + $0x20] sm:$0xff]  }
 0xa71   :  { %1910 = vmatprep.subr.bf16.mxu1 %v2165_v0 }
 0xa74   :  { %1911 = vmatpush3.bf16.msra.mxu1 %v2657_v25 }
 0xa75   :  { %1912 = vmatprep.subr.bf16.mxu1 %v2165_v0 }
 0xa78   :  { %1913 = vmatpush3.bf16.msra.mxu1 %v2664_v27 }
 0xa79   :  { %1914 = vmatprep.subr.bf16.mxu1 %v2165_v0 }
 0xa7c   :  { %1915 = vmatpush3.bf16.msra.mxu1 %v2671_v1 }
 0xa7d   :  { %1916 = vmatprep.subr.bf16.mxu1 %v2165_v0 }
 0xa80   :  { %1917 = vmatpush3.bf16.msra.mxu1 %v2678_v30 }
 0xa81   :  { %1918 = vmatprep.subr.bf16.mxu1 %v2165_v0 }
 0xa84   :  { %1919 = vmatpush3.bf16.msra.mxu1 %v2081_v6 }
 0xa85   :  { %1920 = vmatprep.subr.bf16.mxu1 %v2165_v0 }
 0xa88   :  { %1921 = vmatpush3.bf16.msra.mxu1 %v2082_v7 }
 0xa89   :  { %1922 = vmatprep.subr.bf16.mxu1 %v2165_v0 }
 0xa8c   :  { %1923 = vmatpush3.bf16.msra.mxu1 %v2083_v10 }
 0xa8d   :  { %1948 = vmatprep.subr.mxu1 %v2165_v0 }
 0xad7   :  { %v989_v12 = vpop.permute.xlu0 %988 }
 0xad8   :  { %v990_v62 = vadd.f32 %v989_v12, %v987_v61 }
 0xada   :  { %v991_v54 = vpack.c.bf16 %v990_v62, %v990_v62 }
 0xadc   :  { %1865 = vmatmul.mubr.bf16.vlgmr.msra.gmra.mxu0 %v991_v54 }
 0xadd   :  { %1889 = vmatpush3.bf16.msra.mxu0 %v2754_v22  ;;  %1904 = vmatprep.mubr.msk.bf16.mxu0 %vm2166_vm0, %v2165_v0 }
 0xade   :  { %1890 = vmatprep.subr.bf16.mxu0 %v2165_v0 }
 0xae1   :  { %1891 = vmatpush3.bf16.msra.mxu0 %v2760_v63 }
 0xae2   :  { %1892 = vmatprep.subr.bf16.mxu0 %v2165_v0 }
 0xae5   :  { %1893 = vmatpush3.bf16.msra.mxu0 %v2764_v60 }
 0xae6   :  { %1894 = vmatprep.subr.bf16.mxu0 %v2165_v0 }
 0xae9   :  { %1895 = vmatpush3.bf16.msra.mxu0 %v2768_v13 }
 0xaea   :  { %1896 = vmatprep.subr.bf16.mxu0 %v2165_v0 }
 0xaed   :  { %1897 = vmatpush3.bf16.msra.mxu0 %v2352_v53  ;;  %v2783_v53 = vld [vmem:[%s2878_s2] ss:$0 sm:$0xff] }
 0xaee   :  { %1898 = vmatprep.subr.bf16.mxu0 %v2165_v0  ;;  %v214_v55 = vadd.f32 %v2783_v53, %v2433_v20 }
 0xaf1   :  { %1899 = vmatpush3.bf16.msra.mxu0 %v2364_v56  ;;  %v209_v56 = vadd.f32 %v2783_v53, %v2437_v23 }
 0xaf2   :  { %1900 = vmatprep.subr.bf16.mxu0 %v2165_v0 }
 0xaf5   :  { %1901 = vmatpush3.bf16.msra.mxu0 %v2373_v57 }
 0xaf6   :  { %1902 = vmatprep.subr.bf16.mxu0 %v2165_v0 }
 0xaf9   :  { %1903 = vmatpush3.bf16.msra.mxu0 %v2378_v58 }
 0xafa   :  { %1928 = vmatprep.subr.bf16.mxu0 %v2165_v0 }
 0xb2f   :  { %v1082_v25 = vpop.f32.mrf.mxu1 }
 0xb30   :  { %v1088_v3 = vadd.f32 %v1082_v25, %v209_v56 }
 0xb31   :  { %v1886_v27 = vpop.f32.mrf.mxu1 }
 0xb32   :  { %2056 = vtanh.f32 %v1088_v3 }
 0xb33   :  { %v1085_v1 = vpop.f32.mrf.mxu1 }
 0xb35   :  { %v1887_v30 = vpop.f32.mrf.mxu1 }
 0xb3f   :  { %v2057_v21 = vpop.eup %2056 }
 0xb40   :  { %v1090_v43 = vmul.f32 %v2057_v21, %v2327_v42 }
 0xb42   :  { %v1091_v23 = vadd.f32 %v1090_v43, %v2331_v45 }
 0xb9c   :  { %v1026_v57 = vpop.f32.mrf.mxu0 }
 0xb9d   :  { %v1027_v5 = vadd.f32 %v2442_v26, %v1026_v57 }
 0xb9e   :  { %v1866_v58 = vpop.f32.mrf.mxu0 }
 0xb9f   :  { %2058 = vtanh.f32 %v1027_v5 }
 0xba0   :  { %v1029_v8 = vpop.f32.mrf.mxu0 }
 0xba2   :  { %v1867_v18 = vpop.f32.mrf.mxu0 }
 0xbac   :  { %v2059_v24 = vpop.eup %2058 }
 0xbad   :  { %v1033_v28 = vmul.f32 %v2059_v24, %v2327_v42 }
 0xbaf   :  { %v1034_v40 = vadd.f32 %v1033_v28, %v2331_v45 }
 0xbb1   :  { %1037 = vrot.lane.b32.xlu0 %v1034_v40, %s2159_s30  ;;  %1035 = vrot.lane.b32.xlu1 %v1034_v40, %s2170_s9 }
 0xbb5   :  { %1092 = vrot.lane.b32.xlu0 %v1091_v23, %s2170_s9  ;;  %1039 = vrot.lane.b32.xlu1 %v1034_v40, %s2169_s29 }
 0xbb9   :  { %1096 = vrot.lane.b32.xlu0 %v1091_v23, %s2169_s29  ;;  %1094 = vrot.lane.b32.xlu1 %v1091_v23, %s2159_s30 }
 0xc23   :  { %v1038_v46 = vpop.permute.xlu0 %1037  ;;  %v1036_v11 = vpop.permute.xlu1 %1035 }
 0xc24   :  { %v1042_v14 = vmul.f32 %v1038_v46, %v1034_v40  ;;  %v1041_v9 = vmul.f32 %v1036_v11, %v2720_v41 }
 0xc26   :  { %v2799_v32 = vadd.f32 %v1042_v14, %v1041_v9 }
 0xc27   :  { %v1040_v33 = vpop.permute.xlu1 %1039  ;;  %v1093_v34 = vpop.permute.xlu0 %1092 }
 0xc28   :  { %2060 = vtanh.f32 %v2799_v32  ;;  %v1098_v36 = vmul.f32 %v1093_v34, %v2724_v16  ;;  %v1292_v34 = vld [vmem:[#allocation6 + $0x68] sm:$0xff] }
 0xc2b   :  { %v1095_v35 = vpop.permute.xlu1 %1094  ;;  %v1097_v41 = vpop.permute.xlu0 %1096 }
 0xc2c   :  { %v1099_v31 = vmul.f32 %v1095_v35, %v1091_v23  ;;  %v1291_v35 = vld [vmem:[#allocation6 + $0x60] sm:$0xff] }
 0xc2e   :  { %v2803_v17 = vadd.f32 %v1099_v31, %v1098_v36  ;;  %v1290_v36 = vld [vmem:[#allocation6 + $0x58] sm:$0xff] }
 0xc30   :  { %2062 = vtanh.f32 %v2803_v17 }
 0xc35   :  { %v2061_v37 = vpop.eup %2060 }
 0xc36   :  { %v1045_v29 = vmul.f32 %v2061_v37, %v1040_v33  ;;  %v1293_v33 = vld [vmem:[#allocation6 + $0x70] sm:$0xff] }
 0xc38   :  { %v1046_v38 = vmul.f32 %v2386_v4, %v1045_v29 }
 0xc3a   :  { %1104 = vrot.lane.b32.xlu1 %v1046_v38, %s2169_s29 }
 0xc3d   :  { %v2063_v39 = vpop.eup %2062 }
 0xc3e   :  { %v1102_v44 = vmul.f32 %v2063_v39, %v1097_v41  ;;  %v1289_v41 = vld [vmem:[#allocation6 + $0x50] sm:$0xff] }
 0xc40   :  { %v1103_v47 = vmul.f32 %v2386_v4, %v1102_v44  ;;  %v1288_v44 = vld [vmem:[#allocation6 + $0x48] sm:$0xff] }
 0xc42   :  { %v1163_v19 = vpack.c.bf16 %v1103_v47, %v1103_v47 }
 0xc44   :  { %1925 = vmatmul.mubr.bf16.vlgmr.msra.gmra.mxu1 %v1163_v19  ;;  %v1286_v19 = vld [vmem:[#allocation6 + $0x38] sm:$0xff] }
 0xc45   :  { %1980 = vmatprep.mubr.msk.f32.mxu1 %vm2166_vm0, %v2165_v0 }
 0xcac   :  { %v1105_v48 = vpop.permute.xlu1 %1104 }
 0xcad   :  { %v1106_v49 = vadd.f32 %v1105_v48, %v1103_v47  ;;  %v1287_v47 = vld [vmem:[#allocation6 + $0x40] sm:$0xff] }
 0xcaf   :  { %v1107_v16 = vpack.c.bf16 %v1106_v49, %v1106_v49 }
 0xcb1   :  { %1905 = vmatmul.mubr.bf16.vlgmr.msra.gmra.mxu0 %v1107_v16  ;;  %v1285_v16 = vld [vmem:[#allocation6 + $0x30] sm:$0xff] }
 0xcb2   :  { %1929 = vmatpush3.bf16.msra.mxu0 %v2754_v22  ;;  %1944 = vmatprep.mubr.msk.bf16.mxu0 %vm2166_vm0, %v2165_v0 }
 0xcb3   :  { %1930 = vmatprep.subr.bf16.mxu0 %v2165_v0 }
 0xcb6   :  { %1931 = vmatpush3.bf16.msra.mxu0 %v2760_v63 }
 0xcb7   :  { %1932 = vmatprep.subr.bf16.mxu0 %v2165_v0 }
 0xcba   :  { %1933 = vmatpush3.bf16.msra.mxu0 %v2764_v60 }
 0xcbb   :  { %1934 = vmatprep.subr.bf16.mxu0 %v2165_v0 }
 0xcbe   :  { %1935 = vmatpush3.bf16.msra.mxu0 %v2768_v13 }
 0xcbf   :  { %1936 = vmatprep.subr.bf16.mxu0 %v2165_v0 }
 0xcc2   :  { %1937 = vmatpush3.bf16.msra.mxu0 %v2089_v50 }
 0xcc3   :  { %1938 = vmatprep.subr.bf16.mxu0 %v2165_v0 }
 0xcc6   :  { %1939 = vmatpush3.bf16.msra.mxu0 %v2090_v15  ;;  %v1284_v15 = vld [vmem:[#allocation6 + $0x28] sm:$0xff] }
 0xcc7   :  { %1940 = vmatprep.subr.bf16.mxu0 %v2165_v0 }
 0xcca   :  { %1941 = vmatpush3.bf16.msra.mxu0 %v2091_v52  ;;  %v1283_v52 = vld [vmem:[#allocation6 + $0x20] sm:$0xff] }
 0xccb   :  { %1942 = vmatprep.subr.bf16.mxu0 %v2165_v0 }
 0xcce   :  { %1943 = vmatpush3.bf16.msra.mxu0 %v2092_v51  ;;  %v1282_v51 = vld [vmem:[#allocation6 + $0x18] sm:$0xff] }
 0xd04   :  { %v1198_v59 = vpop.f32.mrf.mxu1 }
 0xd05   :  { %v1204_v61 = vadd.f32 %v1198_v59, %v214_v55  ;;  %v1279_v55 = vld [vmem:[#allocation6] sm:$0xff] }
 0xd06   :  { %v1926_v2 = vpop.f32.mrf.mxu1 }
 0xd07   :  { %2064 = vtanh.f32 %v1204_v61 }
 0xd08   :  { %v1201_v6 = vpop.f32.mrf.mxu1 }
 0xd0a   :  { %v1927_v7 = vpop.f32.mrf.mxu1 }
 0xd14   :  { %v2065_v63 = vpop.eup %2064 }
 0xd15   :  { %v1206_v20 = vmul.f32 %v2065_v63, %v2327_v42 }
 0xd17   :  { %v1207_v27 = vadd.f32 %v1206_v20, %v2331_v45 }
 0xd71   :  { %v1142_v10 = vpop.f32.mrf.mxu0 }
 0xd72   :  { %v1143_v12 = vadd.f32 %v2442_v26, %v1142_v10 }
 0xd73   :  { %v1906_v62 = vpop.f32.mrf.mxu0 }
 0xd74   :  { %2066 = vtanh.f32 %v1143_v12 }
 0xd75   :  { %v1145_v54 = vpop.f32.mrf.mxu0 }
 0xd77   :  { %v1907_v22 = vpop.f32.mrf.mxu0 }
 0xd78   :  { %v1398_v22 = vld [vmem:[%s2883_s7] ss:$0 sm:$0xff] }
 0xd81   :  { %v2067_v60 = vpop.eup %2066 }
 0xd82   :  { %v1149_v13 = vmul.f32 %v2067_v60, %v2327_v42 }
 0xd84   :  { %v1150_v25 = vadd.f32 %v1149_v13, %v2331_v45 }
 0xd86   :  { %1153 = vrot.lane.b32.xlu1 %v1150_v25, %s2159_s30  ;;  %1151 = vrot.lane.b32.xlu0 %v1150_v25, %s2170_s9 }
 0xd8a   :  { %1208 = vrot.lane.b32.xlu1 %v1207_v27, %s2170_s9  ;;  %1155 = vrot.lane.b32.xlu0 %v1150_v25, %s2169_s29 }
 0xd8e   :  { %1212 = vrot.lane.b32.xlu1 %v1207_v27, %s2169_s29  ;;  %1210 = vrot.lane.b32.xlu0 %v1207_v27, %s2159_s30 }
 0xdf8   :  { %v1154_v26 = vpop.permute.xlu1 %1153  ;;  %v1152_v1 = vpop.permute.xlu0 %1151 }
 0xdf9   :  { %v1158_v30 = vmul.f32 %v1154_v26, %v1150_v25  ;;  %v1157_v53 = vmul.f32 %v1152_v1, %v2799_v32  ;;  %v1294_v32 = vld [vmem:[#allocation6 + $0x78] sm:$0xff] }
 0xdfa   :  { %1949 = vmatpush3.msra.mxu1 %v1294_v32 }
 0xdfb   :  { %v2838_v56 = vadd.f32 %v1158_v30, %v1157_v53  ;;  %1950 = vmatprep.subr.mxu1 %v2165_v0 }
 0xdfc   :  { %v1156_v57 = vpop.permute.xlu0 %1155  ;;  %v1209_v18 = vpop.permute.xlu1 %1208  ;;  %1951 = vmatpush3.msra.mxu1 %v1293_v33 }
 0xdfd   :  { %2068 = vtanh.f32 %v2838_v56  ;;  %v1214_v24 = vmul.f32 %v1209_v18, %v2803_v17  ;;  %1952 = vmatprep.subr.mxu1 %v2165_v0  ;;  %v2093_v17 = vld [vmem:[%s2881_s5] ss:$0 sm:$0xff] }
 0xdfe   :  { %1953 = vmatpush3.msra.mxu1 %v1292_v34 }
 0xdff   :  { %1954 = vmatprep.subr.mxu1 %v2165_v0 }
 0xe00   :  { %v1211_v8 = vpop.permute.xlu0 %1210  ;;  %v1213_v43 = vpop.permute.xlu1 %1212  ;;  %1955 = vmatpush3.msra.mxu1 %v1291_v35 }
 0xe01   :  { %v1215_v21 = vmul.f32 %v1211_v8, %v1207_v27  ;;  %1956 = vmatprep.subr.mxu1 %v2165_v0 }
 0xe02   :  { %1957 = vmatpush3.msra.mxu1 %v1290_v36 }
 0xe03   :  { %v1216_v28 = vadd.f32 %v1215_v21, %v1214_v24  ;;  %1958 = vmatprep.subr.mxu1 %v2165_v0 }
 0xe04   :  { %1959 = vmatpush3.msra.mxu1 %v1289_v41 }
 0xe05   :  { %2070 = vtanh.f32 %v1216_v28  ;;  %1960 = vmatprep.subr.mxu1 %v2165_v0 }
 0xe06   :  { %1961 = vmatpush3.msra.mxu1 %v1288_v44 }
 0xe07   :  { %1962 = vmatprep.subr.mxu1 %v2165_v0 }
 0xe08   :  { %1963 = vmatpush3.msra.mxu1 %v1287_v47 }
 0xe09   :  { %1964 = vmatprep.subr.mxu1 %v2165_v0 }
 0xe0a   :  { %v2069_v3 = vpop.eup %2068  ;;  %1965 = vmatpush3.msra.mxu1 %v1286_v19 }
 0xe0b   :  { %v1161_v5 = vmul.f32 %v2069_v3, %v1156_v57  ;;  %1966 = vmatprep.subr.mxu1 %v2165_v0 }
 0xe0c   :  { %1967 = vmatpush3.msra.mxu1 %v1285_v16 }
 0xe0d   :  { %v1162_v58 = vmul.f32 %v2386_v4, %v1161_v5  ;;  %1968 = vmatprep.subr.mxu1 %v2165_v0 }
 0xe0e   :  { %1969 = vmatpush3.msra.mxu1 %v1284_v15 }
 0xe0f   :  { %1220 = vrot.lane.b32.xlu0 %v1162_v58, %s2169_s29  ;;  %1970 = vmatprep.subr.mxu1 %v2165_v0 }
 0xe10   :  { %1971 = vmatpush3.msra.mxu1 %v1283_v52 }
 0xe11   :  { %1972 = vmatprep.subr.mxu1 %v2165_v0 }
 0xe12   :  { %v2071_v40 = vpop.eup %2070  ;;  %1973 = vmatpush3.msra.mxu1 %v1282_v51 }
 0xe13   :  { %v1218_v23 = vmul.f32 %v2071_v40, %v1213_v43  ;;  %1974 = vmatprep.subr.mxu1 %v2165_v0 }
 0xe15   :  { %v1219_v46 = vmul.f32 %v2386_v4, %v1218_v23 }
 0xe81   :  { %v1221_v11 = vpop.permute.xlu0 %1220 }
 0xe82   :  { %v1222_v14 = vadd.f32 %v1221_v11, %v1219_v46 }
 0xe84   :  { %v1223_v9 = vpack.c.bf16 %v1222_v14, %v1222_v14 }
 0xe86   :  { %1945 = vmatmul.mubr.bf16.vlgmr.msra.gmra.mxu0 %v1223_v9 }
 0xf46   :  { %v1258_v31 = vpop.f32.mrf.mxu0 }
 0xf47   :  { %v1259_v37 = vadd.f32 %v2093_v17, %v1258_v31 }
 0xf48   :  { %v1946_v29 = vpop.f32.mrf.mxu0 }
 0xf49   :  { %2072 = vtanh.f32 %v1259_v37 }
 0xf4a   :  { %v1261_v38 = vpop.f32.mrf.mxu0 }
 0xf4c   :  { %v1947_v39 = vpop.f32.mrf.mxu0 }
 0xf56   :  { %v2073_v48 = vpop.eup %2072 }
 0xf57   :  { %v1265_v49 = vmul.f32 %v2073_v48, %v2327_v42  ;;  %v1281_v42 = vld [vmem:[#allocation6 + $0x10] sm:$0xff] }
 0xf58   :  { %1975 = vmatpush3.msra.mxu1 %v1281_v42 }
 0xf59   :  { %v1266_v50 = vadd.f32 %v1265_v49, %v2331_v45  ;;  %v1280_v45 = vld [vmem:[#allocation6 + $0x8] sm:$0xff]  ;;  %1976 = vmatprep.subr.mxu1 %v2165_v0 }
 0xf5a   :  { %1977 = vmatpush3.msra.mxu1 %v1280_v45 }
 0xf5b   :  { %1269 = vrot.lane.b32.xlu0 %v1266_v50, %s2159_s30  ;;  %1267 = vrot.lane.b32.xlu1 %v1266_v50, %s2170_s9 }
 0xf5c   :  { %1978 = vmatprep.subr.mxu1 %v2165_v0 }
 0xf5d   :  { %1979 = vmatpush3.msra.mxu1 %v1279_v55 }
 0xf5f   :  { %1271 = vrot.lane.b32.xlu1 %v1266_v50, %s2169_s29 }
 0xfcd   :  { %v1270_v59 = vpop.permute.xlu0 %1269  ;;  %v1268_v61 = vpop.permute.xlu1 %1267 }
 0xfce   :  { %v1274_v2 = vmul.f32 %v1270_v59, %v1266_v50  ;;  %v1273_v6 = vmul.f32 %v1268_v61, %v2838_v56 }
 0xfd0   :  { %v1275_v7 = vadd.f32 %v1274_v2, %v1273_v6 }
 0xfd1   :  { %v1272_v12 = vpop.permute.xlu1 %1271 }
 0xfd2   :  { %2074 = vtanh.f32 %v1275_v7 }
 0xfdf   :  { %v2075_v10 = vpop.eup %2074 }
 0xfe0   :  { %v1277_v62 = vmul.f32 %v2075_v10, %v1272_v12 }
 0xfe2   :  { %v1278_v54 = vmul.f32 %v2386_v4, %v1277_v62 }
 0xfe4   :  { %1981 = vmatmul.mubr.f32.vlgmr.msra.gmra.mxu1 %v1278_v54 }
0x10a4   :  { %v1368_v63 = vpop.f32.mrf.mxu1 }
0x10a5   :  { %v1369_v0 = vadd.f32 %v1398_v22, %v1368_v63 }
0x10a6   :  { %v1982_v60 = vpop.f32.mrf.mxu1 }
0x10a7   :  { %1372 = vst [vmem:[%s2884_s8] sm:$0xff] %v1369_v0 }
0x10a8   :  { %1377 = vsyncpa [#allocation3], 1 }
0x10a9   :  { %1378 = vsyncpa [#allocation5], 1 }

</bundles_post_ra>
